<compile_context>
chip_gen: v5e
topology: v5e:2x2
jax: 0.10.0
libtpu: 0.0.40
codegen_flags: <defaults>
</compile_context>

<pallas_src>
import functools

import jax
import jax.numpy as jnp
from jax import lax
from jax.experimental import pallas as pl
from jax.experimental.pallas import tpu as pltpu


# ---------------------------------------------------------------------------
# Kernel helpers
# ---------------------------------------------------------------------------
def _sim_block(feat_r_ref, feat_c_ref, inv_temperature, compute_dtype):
    """[TM, TK] block of anchor_dot_contrast = (anchor @ contrast.T) / T."""
    # Scale the small [TM, D] operand (O(TM*D) muls, not O(TM*TK)).
    a = (feat_r_ref[...] * inv_temperature).astype(compute_dtype)
    b = feat_c_ref[...].astype(compute_dtype)
    # Contract last dim of both operands: no transposed copy through the XLU.
    return lax.dot_general(
        a, b, dimension_numbers=(((1,), (1,)), ((), ())),
        preferred_element_type=jnp.float32)


def _masks_block(i, j, block_m, block_k, n_valid):
    """(valid_cols bool, non-diagonal float) masks for the current tile."""
    row_ids = i * block_m + lax.broadcasted_iota(jnp.int32, (block_m, block_k), 0)
    col_ids = j * block_k + lax.broadcasted_iota(jnp.int32, (block_m, block_k), 1)
    valid = col_ids < n_valid                      # mask out padded columns
    nondiag = jnp.where(row_ids == col_ids, 0.0, 1.0)   # logits_mask (no self)
    return valid, nondiag


def _supcon_tile(j, nc, adc, pos, nondiag, valid,
                 loss_ref, m_sc, l_sc, sma_sc, sm_sc, *, loss_scale):
    """Online (flash-style) per-row max / logsumexp / positive-sum update."""
    @pl.when(j == 0)
    def _init():
        m_sc[...] = jnp.full(m_sc.shape, -jnp.inf, m_sc.dtype)
        l_sc[...] = jnp.zeros(l_sc.shape, l_sc.dtype)
        sma_sc[...] = jnp.zeros(sma_sc.shape, sma_sc.dtype)
        sm_sc[...] = jnp.zeros(sm_sc.shape, sm_sc.dtype)

    adc_valid = jnp.where(valid, adc, -jnp.inf)    # padded cols never win max
    m_prev = m_sc[...]
    m_new = jnp.maximum(m_prev, jnp.max(adc_valid, axis=1, keepdims=True))
    alpha = jnp.exp(m_prev - m_new)                # exactly 0 on the first tile
    p = jnp.exp(adc_valid - m_new) * nondiag       # exp_logits * logits_mask

    l_sc[...] = alpha * l_sc[...] + jnp.sum(p, axis=1, keepdims=True)
    sma_sc[...] = sma_sc[...] + jnp.sum(pos * adc, axis=1, keepdims=True)
    sm_sc[...] = sm_sc[...] + jnp.sum(pos, axis=1, keepdims=True)
    m_sc[...] = m_new

    @pl.when(j == nc - 1)
    def _finalize():
        # log(sum_c exp(adc) * logits_mask); the stabilizing row-max cancels.
        log_denom = m_sc[...] + jnp.log(l_sc[...])
        # NOTE: rows with no positives give 0/0 -> NaN, same hazard as the
        # PyTorch original (which does not clamp the denominator either).
        mean_log_prob_pos = sma_sc[...] / sm_sc[...] - log_denom
        loss_ref[...] = (-loss_scale) * mean_log_prob_pos


def _supcon_labels_kernel(feat_r_ref, feat_c_ref, lab_r_ref, lab_c_ref,
                          loss_ref, m_sc, l_sc, sma_sc, sm_sc, *,
                          inv_temperature, loss_scale, n_valid,
                          block_m, block_k, compute_dtype):
    i = pl.program_id(0)
    j = pl.program_id(1)
    nc = pl.num_programs(1)

    adc = _sim_block(feat_r_ref, feat_c_ref, inv_temperature, compute_dtype)
    valid, nondiag = _masks_block(i, j, block_m, block_k, n_valid)

    # Positive-pair mask generated on the fly from the label vectors: no
    # [N, N] mask is ever materialized or DMA'd.
    eq = (lab_r_ref[...] == lab_c_ref[...]).astype(jnp.float32)   # [TM,TK]
    pos = eq * nondiag * valid.astype(jnp.float32)

    _supcon_tile(j, nc, adc, pos, nondiag, valid,
                 loss_ref, m_sc, l_sc, sma_sc, sm_sc, loss_scale=loss_scale)


def _supcon_mask_kernel(feat_r_ref, feat_c_ref, mask_ref,
                        loss_ref, m_sc, l_sc, sma_sc, sm_sc, *,
                        inv_temperature, loss_scale, n_valid,
                        block_m, block_k, compute_dtype):
    i = pl.program_id(0)
    j = pl.program_id(1)
    nc = pl.num_programs(1)

    adc = _sim_block(feat_r_ref, feat_c_ref, inv_temperature, compute_dtype)
    valid, nondiag = _masks_block(i, j, block_m, block_k, n_valid)

    pos = mask_ref[...].astype(jnp.float32) * nondiag * valid.astype(jnp.float32)

    _supcon_tile(j, nc, adc, pos, nondiag, valid,
                 loss_ref, m_sc, l_sc, sma_sc, sm_sc, loss_scale=loss_scale)


# ---------------------------------------------------------------------------
# Wrapper
# ---------------------------------------------------------------------------
def _round_up(x, m):
    return ((x + m - 1) // m) * m


def _pad2d(x, rows, cols):
    r, c = x.shape
    return jnp.pad(x, ((0, rows - r), (0, cols - c)))


def supcon_loss(features, labels=None, mask=None, *, temperature=0.07,
                contrast_mode="all", base_temperature=0.07,
                compute_dtype=jnp.float32):
    """JAX/Pallas equivalent of SupConLoss.forward.

    features: [bsz, n_views, ...] (extra trailing dims flattened)
    labels:   [bsz] int, optional
    mask:     [bsz, bsz] float, optional (mutually exclusive with labels)
    compute_dtype: dtype fed to the MXU for the similarity matmul
                   (jnp.bfloat16 recommended on v6e/v7x; accumulation is f32).
    """
    if features.ndim < 3:
        raise ValueError("`features` needs to be [bsz, n_views, ...]")
    if features.ndim > 3:
        features = features.reshape(features.shape[0], features.shape[1], -1)
    bsz, n_views, dim = features.shape

    if labels is not None and mask is not None:
        raise ValueError("Cannot define both `labels` and `mask`")

    contrast_count = n_views
    # torch.cat(torch.unbind(features, dim=1), dim=0): view-major [N, dim]
    contrast_feature = jnp.transpose(features, (1, 0, 2)).reshape(
        n_views * bsz, dim)

    if contrast_mode == "one":
        anchor_feature = features[:, 0, :]
        anchor_count = 1
    elif contrast_mode == "all":
        anchor_feature = contrast_feature
        anchor_count = contrast_count
    else:
        raise ValueError(f"Unknown mode: {contrast_mode}")

    m_rows = bsz * anchor_count        # number of anchors (output rows)
    n_cols = bsz * contrast_count      # number of contrast samples (columns)

    # ---- padding & tile selection (lane-dense, (8,128)-aligned) -----------
    f32 = jnp.float32
    dp = _round_up(max(dim, 128), 128)
    m_pad = _round_up(max(m_rows, 128), 128)
    n_pad = _round_up(max(n_cols, 128), 128)
    tm = 256 if m_pad % 256 == 0 else 128
    tk = 512 if n_pad % 512 == 0 else (256 if n_pad % 256 == 0 else 128)
    if dp >= 2048:
        # keep double-buffered feature tiles well inside default scoped VMEM
        # TODO(synk): tile the contraction (D) axis for very large feature dims.
        tm, tk = 128, 128

    anchor_p = _pad2d(anchor_feature.astype(f32), m_pad, dp)
    contrast_p = _pad2d(contrast_feature.astype(f32), n_pad, dp)

    grid = (m_pad // tm, n_pad // tk)
    common = dict(inv_temperature=1.0 / float(temperature),
                  loss_scale=float(temperature) / float(base_temperature),
                  n_valid=n_cols, block_m=tm, block_k=tk,
                  compute_dtype=compute_dtype)

    feat_specs = [pl.BlockSpec((tm, dp), lambda i, j: (i, 0)),   # anchor rows
                  pl.BlockSpec((tk, dp), lambda i, j: (j, 0))]   # contrast cols
    out_spec = pl.BlockSpec((tm, 1), lambda i, j: (i, 0))
    out_shape = jax.ShapeDtypeStruct((m_pad, 1), f32)
    scratch = [pltpu.VMEM((tm, 1), f32)] * 4                      # m, l, sma, sm
    cparams = pltpu.CompilerParams(
        dimension_semantics=("parallel", "arbitrary"))

    if mask is None:
        # labels path (or SimCLR eye mask when labels is also None)
        if labels is None:
            base_labels = jnp.arange(bsz, dtype=jnp.int32)        # eye mask
        else:
            labels = jnp.asarray(labels).reshape(-1)
            if labels.shape[0] != bsz:
                raise ValueError("Num of labels does not match num of features")
            base_labels = labels.astype(jnp.int32)

        col_labels = jnp.tile(base_labels, contrast_count)         # [N]
        row_labels = col_labels if contrast_mode == "all" else base_labels
        row_labels = jnp.pad(row_labels, (0, m_pad - m_rows),
                             constant_values=-1).reshape(m_pad, 1)
        col_labels = jnp.pad(col_labels, (0, n_pad - n_cols),
                             constant_values=-1).reshape(1, n_pad)

        kernel = functools.partial(_supcon_labels_kernel, **common)
        per_anchor = pl.pallas_call(
            kernel,
            out_shape=out_shape,
            grid_spec=pltpu.PrefetchScalarGridSpec(
                num_scalar_prefetch=0,
                grid=grid,
                in_specs=feat_specs + [
                    pl.BlockSpec((tm, 1), lambda i, j: (i, 0)),    # row labels
                    pl.BlockSpec((1, tk), lambda i, j: (0, j)),    # col labels
                ],
                out_specs=out_spec,
                scratch_shapes=scratch),
            compiler_params=cparams,
        )(anchor_p, contrast_p, row_labels, col_labels)
    else:
        # arbitrary user mask: stream [tm, tk] blocks of the tiled mask
        mask_full = jnp.tile(jnp.asarray(mask).astype(f32),
                             (anchor_count, contrast_count))
        mask_full = _pad2d(mask_full, m_pad, n_pad)

        kernel = functools.partial(_supcon_mask_kernel, **common)
        per_anchor = pl.pallas_call(
            kernel,
            out_shape=out_shape,
            grid_spec=pltpu.PrefetchScalarGridSpec(
                num_scalar_prefetch=0,
                grid=grid,
                in_specs=feat_specs + [
                    pl.BlockSpec((tm, tk), lambda i, j: (i, j)),
                ],
                out_specs=out_spec,
                scratch_shapes=scratch),
            compiler_params=cparams,
        )(anchor_p, contrast_p, mask_full)

    # loss.view(anchor_count, batch_size).mean() == mean over all real anchors
    return jnp.mean(per_anchor[:m_rows, 0])


# ---------------------------------------------------------------------------
# Pure-JAX reference (mirrors the PyTorch module, mode='all')
# ---------------------------------------------------------------------------
def _reference_supcon(features, labels, temperature=0.07, base_temperature=0.07):
    bsz, n_views, _ = features.shape
    lab = labels.reshape(-1, 1)
    mask = (lab == lab.T).astype(jnp.float32)
    contrast = jnp.concatenate([features[:, v, :] for v in range(n_views)], 0)
    # (contrast / T) @ contrast.T == torch.div(matmul(...), T) mathematically;
    # scaling one operand mirrors the kernel so MXU input rounding matches.
    adc = jnp.matmul(contrast * (1.0 / temperature), contrast.T)
    logits = adc - jnp.max(adc, axis=1, keepdims=True)
    n = bsz * n_views
    mask = jnp.tile(mask, (n_views, n_views))
    logits_mask = 1.0 - jnp.eye(n, dtype=jnp.float32)
    mask = mask * logits_mask
    exp_logits = jnp.exp(logits) * logits_mask
    log_prob = logits - jnp.log(exp_logits.sum(1, keepdims=True))
    mlp = (mask * log_prob).sum(1) / mask.sum(1)
    return jnp.mean(-(temperature / base_temperature) * mlp)


if __name__ == "__main__":
    key = jax.random.PRNGKey(0)
    k1, k2 = jax.random.split(key)

    # small config matching the module's expected [bsz, n_views, dim] input
    bsz, n_views, dim = 8, 2, 32
    feats = jax.random.normal(k1, (bsz, n_views, dim), dtype=jnp.float32)
    feats = feats / jnp.linalg.norm(feats, axis=-1, keepdims=True)
    labels = jnp.array([0, 1, 0, 1, 2, 2, 3, 3], dtype=jnp.int32)

    loss = jax.block_until_ready(supcon_loss(feats, labels=labels))
    ref = _reference_supcon(feats, labels)
    assert jnp.allclose(loss, ref, rtol=1e-4, atol=1e-4), (loss, ref)

    # SimCLR (unsupervised) path: labels=None, mask=None -> eye mask
    loss_u = jax.block_until_ready(supcon_loss(feats))
    ref_u = _reference_supcon(feats, jnp.arange(bsz, dtype=jnp.int32))
    assert jnp.allclose(loss_u, ref_u, rtol=1e-4, atol=1e-4), (loss_u, ref_u)

    # explicit user-mask path (should reproduce the labels-path loss)
    user_mask = (labels[:, None] == labels[None, :]).astype(jnp.float32)
    loss_m = jax.block_until_ready(supcon_loss(feats, mask=user_mask))
    assert jnp.allclose(loss_m, ref, rtol=1e-4, atol=1e-4), (loss_m, ref)

    # larger run exercising multiple row/column tiles, ragged padding and the
    # online (flash-style) max / logsumexp accumulation across column tiles
    bsz2, n_views2, dim2 = 150, 2, 48          # N = 300 -> padded 384, D -> 128
    feats2 = jax.random.normal(k2, (bsz2, n_views2, dim2), dtype=jnp.float32)
    feats2 = feats2 / jnp.linalg.norm(feats2, axis=-1, keepdims=True)
    labels2 = jnp.arange(bsz2, dtype=jnp.int32) % 10
    loss2 = jax.block_until_ready(supcon_loss(feats2, labels=labels2))
    ref2 = _reference_supcon(feats2, labels2)
    assert jnp.allclose(loss2, ref2, rtol=1e-4, atol=1e-4), (loss2, ref2)

    print("KERNEL_OK")
</pallas_src>

<mosaic_0001>
module attributes {stable_mosaic.version = 11 : i64} {
  func.func @_supcon_labels_kernel(%arg0: i32, %arg1: i32, %arg2: memref<128x128xf32, #tpu.memory_space<vmem>>, %arg3: memref<128x128xf32, #tpu.memory_space<vmem>>, %arg4: memref<128x1xi32, #tpu.memory_space<vmem>>, %arg5: memref<1x128xi32, #tpu.memory_space<vmem>>, %arg6: memref<128x1xf32, #tpu.memory_space<vmem>>, %arg7: memref<128x1xf32, #tpu.memory_space<vmem>>, %arg8: memref<128x1xf32, #tpu.memory_space<vmem>>, %arg9: memref<128x1xf32, #tpu.memory_space<vmem>>, %arg10: memref<128x1xf32, #tpu.memory_space<vmem>>) attributes {dimension_semantics = [#tpu.dimension_semantics<parallel>, #tpu.dimension_semantics<arbitrary>], iteration_bounds = array<i64: 1, 1>, scalar_prefetch = 0 : i64, scratch_operands = 4 : i64, tpu.core_type = #tpu.core_type<tc>, window_params = [{transform_indices = @transform_0, window_bounds = array<i64: 128, 128>}, {transform_indices = @transform_1, window_bounds = array<i64: 128, 128>}, {transform_indices = @transform_2, window_bounds = array<i64: 128, 1>}, {transform_indices = @transform_3, window_bounds = array<i64: 1, 128>}, {transform_indices = @transform_4, window_bounds = array<i64: 128, 1>}]} {
    %c0 = arith.constant 0 : index
    %c0_0 = arith.constant 0 : index
    %0 = vector.load %arg2[%c0, %c0_0] : memref<128x128xf32, #tpu.memory_space<vmem>>, vector<128x128xf32>
    %cst = arith.constant 14.2857141 : f32
    %1 = vector.broadcast %cst : f32 to vector<128x128xf32>
    %2 = arith.mulf %0, %1 : vector<128x128xf32>
    %c0_1 = arith.constant 0 : index
    %c0_2 = arith.constant 0 : index
    %3 = vector.load %arg3[%c0_1, %c0_2] : memref<128x128xf32, #tpu.memory_space<vmem>>, vector<128x128xf32>
    %cst_3 = arith.constant dense<0.000000e+00> : vector<128x128xf32>
    %4 = tpu.matmul %2, %3, %cst_3 {dimension_numbers = #tpu.dot_dimension_numbers<[1], [1], [0], [0], [0, 0, 1, 0], [], []>} : vector<128x128xf32>, vector<128x128xf32>, vector<128x128xf32> -> vector<128x128xf32>
    %c128_i32 = arith.constant 128 : i32
    %5 = arith.muli %arg0, %c128_i32 : i32
    %6 = tpu.iota {dimensions = array<i32: 0>} : vector<128x128xi32>
    %7 = vector.broadcast %5 : i32 to vector<128x128xi32>
    %8 = arith.addi %7, %6 : vector<128x128xi32>
    %c128_i32_4 = arith.constant 128 : i32
    %9 = arith.muli %arg1, %c128_i32_4 : i32
    %10 = tpu.iota {dimensions = array<i32: 1>} : vector<128x128xi32>
    %11 = vector.broadcast %9 : i32 to vector<128x128xi32>
    %12 = arith.addi %11, %10 : vector<128x128xi32>
    %c16_i32 = arith.constant 16 : i32
    %13 = vector.broadcast %c16_i32 : i32 to vector<128x128xi32>
    %14 = arith.cmpi slt, %12, %13 : vector<128x128xi32>
    %15 = arith.cmpi eq, %8, %12 : vector<128x128xi32>
    %cst_5 = arith.constant 0.000000e+00 : f32
    %cst_6 = arith.constant 1.000000e+00 : f32
    %16 = vector.broadcast %cst_5 : f32 to vector<128x128xf32>
    %17 = vector.broadcast %cst_6 : f32 to vector<128x128xf32>
    %18 = arith.select %15, %16, %17 : vector<128x128xi1>, vector<128x128xf32>
    %c0_7 = arith.constant 0 : index
    %c0_8 = arith.constant 0 : index
    %19 = vector.load %arg4[%c0_7, %c0_8] : memref<128x1xi32, #tpu.memory_space<vmem>>, vector<128x1xi32>
    %c0_9 = arith.constant 0 : index
    %c0_10 = arith.constant 0 : index
    %20 = vector.load %arg5[%c0_9, %c0_10] : memref<1x128xi32, #tpu.memory_space<vmem>>, vector<1x128xi32>
    %21 = vector.broadcast %19 : vector<128x1xi32> to vector<128x128xi32>
    %22 = vector.broadcast %20 : vector<1x128xi32> to vector<128x128xi32>
    %23 = arith.cmpi eq, %21, %22 : vector<128x128xi32>
    %24 = arith.extui %23 : vector<128x128xi1> to vector<128x128xi32>
    %25 = arith.sitofp %24 : vector<128x128xi32> to vector<128x128xf32>
    %26 = arith.mulf %25, %18 : vector<128x128xf32>
    %27 = arith.extui %14 : vector<128x128xi1> to vector<128x128xi32>
    %28 = arith.sitofp %27 : vector<128x128xi32> to vector<128x128xf32>
    %29 = arith.mulf %26, %28 : vector<128x128xf32>
    %c0_i32 = arith.constant 0 : i32
    %30 = arith.cmpi eq, %arg1, %c0_i32 : i32
    %31 = arith.extui %30 : i1 to i32
    %c0_i32_11 = arith.constant 0 : i32
    %32 = arith.cmpi ne, %31, %c0_i32_11 : i32
    scf.if %32 {
      %cst_35 = arith.constant 0xFF800000 : f32
      %66 = vector.broadcast %cst_35 : f32 to vector<128x1xf32>
      %c0_36 = arith.constant 0 : index
      %c0_37 = arith.constant 0 : index
      %67 = vector.load %arg7[%c0_36, %c0_37] : memref<128x1xf32, #tpu.memory_space<vmem>>, vector<128x1xf32>
      tpu.vector_store %arg7[%c0_36, %c0_37], %66 {strides = array<i32>} : memref<128x1xf32, #tpu.memory_space<vmem>>, vector<128x1xf32>,
      %cst_38 = arith.constant 0.000000e+00 : f32
      %68 = vector.broadcast %cst_38 : f32 to vector<128x1xf32>
      %c0_39 = arith.constant 0 : index
      %c0_40 = arith.constant 0 : index
      %69 = vector.load %arg8[%c0_39, %c0_40] : memref<128x1xf32, #tpu.memory_space<vmem>>, vector<128x1xf32>
      tpu.vector_store %arg8[%c0_39, %c0_40], %68 {strides = array<i32>} : memref<128x1xf32, #tpu.memory_space<vmem>>, vector<128x1xf32>,
      %cst_41 = arith.constant 0.000000e+00 : f32
      %70 = vector.broadcast %cst_41 : f32 to vector<128x1xf32>
      %c0_42 = arith.constant 0 : index
      %c0_43 = arith.constant 0 : index
      %71 = vector.load %arg9[%c0_42, %c0_43] : memref<128x1xf32, #tpu.memory_space<vmem>>, vector<128x1xf32>
      tpu.vector_store %arg9[%c0_42, %c0_43], %70 {strides = array<i32>} : memref<128x1xf32, #tpu.memory_space<vmem>>, vector<128x1xf32>,
      %cst_44 = arith.constant 0.000000e+00 : f32
      %72 = vector.broadcast %cst_44 : f32 to vector<128x1xf32>
      %c0_45 = arith.constant 0 : index
      %c0_46 = arith.constant 0 : index
      %73 = vector.load %arg10[%c0_45, %c0_46] : memref<128x1xf32, #tpu.memory_space<vmem>>, vector<128x1xf32>
      tpu.vector_store %arg10[%c0_45, %c0_46], %72 {strides = array<i32>} : memref<128x1xf32, #tpu.memory_space<vmem>>, vector<128x1xf32>,
    } else {
    }
    %cst_12 = arith.constant 0xFF800000 : f32
    %33 = vector.broadcast %cst_12 : f32 to vector<128x128xf32>
    %34 = arith.select %14, %4, %33 : vector<128x128xi1>, vector<128x128xf32>
    %c0_13 = arith.constant 0 : index
    %c0_14 = arith.constant 0 : index
    %35 = vector.load %arg7[%c0_13, %c0_14] : memref<128x1xf32, #tpu.memory_space<vmem>>, vector<128x1xf32>
    %cst_15 = arith.constant dense<0xFF800000> : vector<128xf32>
    %36 = vector.multi_reduction <maximumf>, %34, %cst_15 [1] : vector<128x128xf32> to vector<128xf32>
    %37 = vector.shape_cast %36 : vector<128xf32> to vector<128x1xf32>
    %38 = arith.maximumf %35, %37 : vector<128x1xf32>
    %39 = arith.subf %35, %38 : vector<128x1xf32>
    %40 = math.exp %39 : vector<128x1xf32>
    %41 = vector.broadcast %38 : vector<128x1xf32> to vector<128x128xf32>
    %42 = arith.subf %34, %41 : vector<128x128xf32>
    %43 = math.exp %42 : vector<128x128xf32>
    %44 = arith.mulf %43, %18 : vector<128x128xf32>
    %c0_16 = arith.constant 0 : index
    %c0_17 = arith.constant 0 : index
    %45 = vector.load %arg8[%c0_16, %c0_17] : memref<128x1xf32, #tpu.memory_space<vmem>>, vector<128x1xf32>
    %46 = arith.mulf %40, %45 : vector<128x1xf32>
    %cst_18 = arith.constant dense<0.000000e+00> : vector<128xf32>
    %47 = vector.multi_reduction <add>, %44, %cst_18 [1] : vector<128x128xf32> to vector<128xf32>
    %48 = vector.shape_cast %47 : vector<128xf32> to vector<128x1xf32>
    %49 = arith.addf %46, %48 : vector<128x1xf32>
    %c0_19 = arith.constant 0 : index
    %c0_20 = arith.constant 0 : index
    %50 = vector.load %arg8[%c0_19, %c0_20] : memref<128x1xf32, #tpu.memory_space<vmem>>, vector<128x1xf32>
    tpu.vector_store %arg8[%c0_19, %c0_20], %49 {strides = array<i32>} : memref<128x1xf32, #tpu.memory_space<vmem>>, vector<128x1xf32>,
    %c0_21 = arith.constant 0 : index
    %c0_22 = arith.constant 0 : index
    %51 = vector.load %arg9[%c0_21, %c0_22] : memref<128x1xf32, #tpu.memory_space<vmem>>, vector<128x1xf32>
    %52 = arith.mulf %29, %4 : vector<128x128xf32>
    %cst_23 = arith.constant dense<0.000000e+00> : vector<128xf32>
    %53 = vector.multi_reduction <add>, %52, %cst_23 [1] : vector<128x128xf32> to vector<128xf32>
    %54 = vector.shape_cast %53 : vector<128xf32> to vector<128x1xf32>
    %55 = arith.addf %51, %54 : vector<128x1xf32>
    %c0_24 = arith.constant 0 : index
    %c0_25 = arith.constant 0 : index
    %56 = vector.load %arg9[%c0_24, %c0_25] : memref<128x1xf32, #tpu.memory_space<vmem>>, vector<128x1xf32>
    tpu.vector_store %arg9[%c0_24, %c0_25], %55 {strides = array<i32>} : memref<128x1xf32, #tpu.memory_space<vmem>>, vector<128x1xf32>,
    %c0_26 = arith.constant 0 : index
    %c0_27 = arith.constant 0 : index
    %57 = vector.load %arg10[%c0_26, %c0_27] : memref<128x1xf32, #tpu.memory_space<vmem>>, vector<128x1xf32>
    %cst_28 = arith.constant dense<0.000000e+00> : vector<128xf32>
    %58 = vector.multi_reduction <add>, %29, %cst_28 [1] : vector<128x128xf32> to vector<128xf32>
    %59 = vector.shape_cast %58 : vector<128xf32> to vector<128x1xf32>
    %60 = arith.addf %57, %59 : vector<128x1xf32>
    %c0_29 = arith.constant 0 : index
    %c0_30 = arith.constant 0 : index
    %61 = vector.load %arg10[%c0_29, %c0_30] : memref<128x1xf32, #tpu.memory_space<vmem>>, vector<128x1xf32>
    tpu.vector_store %arg10[%c0_29, %c0_30], %60 {strides = array<i32>} : memref<128x1xf32, #tpu.memory_space<vmem>>, vector<128x1xf32>,
    %c0_31 = arith.constant 0 : index
    %c0_32 = arith.constant 0 : index
    %62 = vector.load %arg7[%c0_31, %c0_32] : memref<128x1xf32, #tpu.memory_space<vmem>>, vector<128x1xf32>
    tpu.vector_store %arg7[%c0_31, %c0_32], %38 {strides = array<i32>} : memref<128x1xf32, #tpu.memory_space<vmem>>, vector<128x1xf32>,
    %c0_i32_33 = arith.constant 0 : i32
    %63 = arith.cmpi eq, %arg1, %c0_i32_33 : i32
    %64 = arith.extui %63 : i1 to i32
    %c0_i32_34 = arith.constant 0 : i32
    %65 = arith.cmpi ne, %64, %c0_i32_34 : i32
    scf.if %65 {
      %c0_35 = arith.constant 0 : index
      %c0_36 = arith.constant 0 : index
      %66 = vector.load %arg7[%c0_35, %c0_36] : memref<128x1xf32, #tpu.memory_space<vmem>>, vector<128x1xf32>
      %c0_37 = arith.constant 0 : index
      %c0_38 = arith.constant 0 : index
      %67 = vector.load %arg8[%c0_37, %c0_38] : memref<128x1xf32, #tpu.memory_space<vmem>>, vector<128x1xf32>
      %68 = math.log %67 : vector<128x1xf32>
      %69 = arith.addf %66, %68 : vector<128x1xf32>
      %c0_39 = arith.constant 0 : index
      %c0_40 = arith.constant 0 : index
      %70 = vector.load %arg9[%c0_39, %c0_40] : memref<128x1xf32, #tpu.memory_space<vmem>>, vector<128x1xf32>
      %c0_41 = arith.constant 0 : index
      %c0_42 = arith.constant 0 : index
      %71 = vector.load %arg10[%c0_41, %c0_42] : memref<128x1xf32, #tpu.memory_space<vmem>>, vector<128x1xf32>
      %72 = arith.divf %70, %71 : vector<128x1xf32>
      %73 = arith.subf %72, %69 : vector<128x1xf32>
      %cst_43 = arith.constant -1.000000e+00 : f32
      %74 = vector.broadcast %cst_43 : f32 to vector<128x1xf32>
      %75 = arith.mulf %74, %73 : vector<128x1xf32>
      %c0_44 = arith.constant 0 : index
      %c0_45 = arith.constant 0 : index
      %76 = vector.load %arg6[%c0_44, %c0_45] : memref<128x1xf32, #tpu.memory_space<vmem>>, vector<128x1xf32>
      tpu.vector_store %arg6[%c0_44, %c0_45], %75 {strides = array<i32>} : memref<128x1xf32, #tpu.memory_space<vmem>>, vector<128x1xf32>,
    } else {
    }
    return
  }
  func.func @transform_0(%arg0: i32, %arg1: i32) -> (i32, i32) {
    %c0_i32 = arith.constant 0 : i32
    %c0_i32_0 = arith.constant 0 : i32
    return %arg0, %c0_i32 : i32, i32
  }
  func.func @transform_1(%arg0: i32, %arg1: i32) -> (i32, i32) {
    %c0_i32 = arith.constant 0 : i32
    %c0_i32_0 = arith.constant 0 : i32
    return %arg1, %c0_i32 : i32, i32
  }
  func.func @transform_2(%arg0: i32, %arg1: i32) -> (i32, i32) {
    %c0_i32 = arith.constant 0 : i32
    %c0_i32_0 = arith.constant 0 : i32
    return %arg0, %c0_i32 : i32, i32
  }
  func.func @transform_3(%arg0: i32, %arg1: i32) -> (i32, i32) {
    %c0_i32 = arith.constant 0 : i32
    %c0_i32_0 = arith.constant 0 : i32
    return %c0_i32, %arg1 : i32, i32
  }
  func.func @transform_4(%arg0: i32, %arg1: i32) -> (i32, i32) {
    %c0_i32 = arith.constant 0 : i32
    %c0_i32_0 = arith.constant 0 : i32
    return %arg0, %c0_i32 : i32, i32
  }
}

</mosaic_0001>

<bundles_post_ra>
// kernel: tpu_custom_call.1
= control target key start
LH: loop header
LB: loop body
LE: loop exit
PB: predicated region body
PF: predicated region fallthrough
CT: control target
= control target key end

     0   :  { %9 = vsyncpa [#allocation7], 0  ;;  %s1635_s18 = smov [#allocation6]   ;;  %s1636_s20 = smov 128   ;;  %s3013_s0 = inlined_call_operand.vmem [shape: f32[128,128], index: 0, kind: input, shape index: {}]   ;;  %s3014_s1 = inlined_call_operand.hbm [shape: f32[128,128], index: 1, kind: input, shape index: {}]   ;;  %s3015_s2 = inlined_call_operand.vmem [shape: s32[128,1], index: 2, kind: input, shape index: {}]   ;;  %s3016_s3 = inlined_call_operand.vmem [shape: s32[1,128], index: 3, kind: input, shape index: {}]   ;;  %s3017_s4 = inlined_call_operand.vmem [shape: f32[128,1], index: 4, kind: output, shape index: {}]  }
   0x1   :  { %s16_s17 = sshll.u32 %s3014_s1, 4  ;;  %s18_s19 = sshll.u32 %s1635_s18, 4  ;;  %s17_s17 = int_to_ptr.hbm [resolvable:$true] %s16_s17  ;;  %s19_s19 = int_to_ptr.vmem [resolvable:$true] %s18_s19 }
   0x2   :  { %s1637_s21 = smov 8  }
   0x3   :  { %24 = dma.hbm_to_vmem [thread:$0]  %s17_s17, 2048, %s19_s19, [#allocation7], %s1636_s20, %s1636_s20, %s1637_s21  }
   0x4   :  { %1633 = dma.done.wait [#allocation7], 2048  }
   0x5   :  { %1634 = vsyncadd [#allocation7], 4294965248  ;;  %v1638_v0 = vmov 0   ;;  %v221_v1 = vld [vmem:[%s3015_s2 + $0x10] sm:$0xff]  ;;  %v219_v2 = vld [vmem:[%s3015_s2] sm:$0xff] }
   0x6   :  { %1478 = vset.pattern.permute.xlu1 %v1638_v0  ;;  %1477 = vset.pattern.permute.xlu0 %v1638_v0  ;;  %v80_v3 = vld [vmem:[#allocation6 + $0x78] sm:$0xff]  ;;  %v79_v4 = vld [vmem:[#allocation6 + $0x70] sm:$0xff]  ;;  %v223_v5 = vld [vmem:[%s3015_s2 + $0x20] sm:$0xff] }
   0x7   :  { %1479 = vset.pattern.permute.xlu2 %v1638_v0  ;;  %243 = vperm.xlu1 %1478, %v221_v1   ;;  %v222_v6 = vld [vmem:[%s3015_s2 + $0x18] sm:$0xff]  ;;  %v220_v7 = vld [vmem:[%s3015_s2 + $0x8] sm:$0xff]  ;;  %v77_v10 = vld [vmem:[#allocation6 + $0x60] sm:$0xff] }
   0x8   :  { %237 = vperm.xlu0 %1477, %v219_v2   ;;  %81 = vmatpush.xpose.msra.mxu0 %v80_v3  ;;  %v78_v8 = vld [vmem:[#allocation6 + $0x68] sm:$0xff]  ;;  %v226_v11 = vld [vmem:[%s3015_s2 + $0x38] sm:$0xff]  ;;  %v225_v12 = vld [vmem:[%s3015_s2 + $0x30] sm:$0xff]  ;;  %v147_v2 = vlaneseq }
   0x9   :  { %1422 = vmatpush.xpose.msra.mxu1 %v80_v3  ;;  %1423 = vmatpush.xpose.msra.mxu2 %v80_v3  ;;  %v224_v9 = vld [vmem:[%s3015_s2 + $0x28] sm:$0xff]  ;;  %v76_v13 = vld [vmem:[#allocation6 + $0x58] sm:$0xff]  ;;  %v227_v14 = vld [vmem:[%s3015_s2 + $0x40] sm:$0xff] }
   0xa   :  { %1424 = vmatpush.xpose.msra.mxu3 %v80_v3  ;;  %249 = vperm.xlu2 %1479, %v223_v5   ;;  %v75_v15 = vld [vmem:[#allocation6 + $0x50] sm:$0xff]  ;;  %v228_v17 = vld [vmem:[%s3015_s2 + $0x48] sm:$0xff]  ;;  %v230_v19 = vld [vmem:[%s3015_s2 + $0x58] sm:$0xff]  ;;  %v1766_v3 = vshrl.u32 %v147_v2, 7  ;;  %v1768_v5 = vand.u32 127, %v147_v2 }
   0xb   :  { %v229_v16 = vld [vmem:[%s3015_s2 + $0x50] sm:$0xff]  ;;  %v74_v18 = vld [vmem:[#allocation6 + $0x48] sm:$0xff]  ;;  %v73_v20 = vld [vmem:[#allocation6 + $0x40] sm:$0xff] }
   0xc   :  { %82 = vmatpush.xpose.msra.mxu0 %v79_v4  ;;  %v232_v21 = vld [vmem:[%s3015_s2 + $0x68] sm:$0xff]  ;;  %v231_v22 = vld [vmem:[%s3015_s2 + $0x60] sm:$0xff]  ;;  %v72_v23 = vld [vmem:[#allocation6 + $0x38] sm:$0xff]  ;;  %vm187_vm1 = vcmp.eq.s32.totalorder %v1766_v3, %v1768_v5  ;;  %vm186_vm2 = vcmp.lt.s32.totalorder %v1768_v5, 16 }
   0xd   :  { %1425 = vmatpush.xpose.msra.mxu1 %v79_v4  ;;  %1426 = vmatpush.xpose.msra.mxu2 %v79_v4  ;;  %v233_v24 = vld [vmem:[%s3015_s2 + $0x70] sm:$0xff]  ;;  %v234_v26 = vld [vmem:[%s3015_s2 + $0x78] sm:$0xff]  ;;  %v70_v27 = vld [vmem:[#allocation6 + $0x28] sm:$0xff] }
   0xe   :  { %1427 = vmatpush.xpose.msra.mxu3 %v79_v4  ;;  %v71_v25 = vld [vmem:[#allocation6 + $0x30] sm:$0xff]  ;;  %v69_v28 = vld [vmem:[#allocation6 + $0x20] sm:$0xff]  ;;  %v68_v29 = vld [vmem:[#allocation6 + $0x18] sm:$0xff] }
   0xf   :  { %246 = vperm.xlu1 %1478, %v222_v6   ;;  %v67_v30 = vld [vmem:[#allocation6 + $0x10] sm:$0xff]  ;;  %v66_v31 = vld [vmem:[#allocation6 + $0x8] sm:$0xff]  ;;  %v33_v32 = vld [vmem:[%s3013_s0] sm:$0xff]  ;;  %v150_v6 = vadd.s32 16, %v1766_v3 }
  0x10   :  { %240 = vperm.xlu0 %1477, %v220_v7   ;;  %83 = vmatpush.xpose.msra.mxu0 %v78_v8  ;;  %v37_v33 = vld [vmem:[%s3013_s0 + $0x20] sm:$0xff]  ;;  %v49_v37 = vmul.f32 14.285714, %v33_v32  ;;  %v34_v41 = vld [vmem:[%s3013_s0 + $0x8] sm:$0xff]  ;;  %v35_v49 = vld [vmem:[%s3013_s0 + $0x10] sm:$0xff]  ;;  %v153_v7 = vadd.s32 40, %v1766_v3 }
  0x11   :  { %1428 = vmatpush.xpose.msra.mxu1 %v78_v8  ;;  %1429 = vmatpush.xpose.msra.mxu2 %v78_v8  ;;  %v65_v34 = vld [vmem:[#allocation6] sm:$0xff]  ;;  %v53_v38 = vmul.f32 14.285714, %v37_v33  ;;  %v38_v42 = vld [vmem:[%s3013_s0 + $0x28] sm:$0xff]  ;;  %v50_v45 = vmul.f32 14.285714, %v34_v41  ;;  %vm189_vm0 = vcmp.eq.s32.totalorder %v150_v6, %v1768_v5 }
  0x12   :  { %1430 = vmatpush.xpose.msra.mxu3 %v78_v8  ;;  %252 = vperm.xlu2 %1479, %v224_v9   ;;  %v41_v35 = vld [vmem:[%s3013_s0 + $0x40] sm:$0xff]  ;;  %v42_v43 = vld [vmem:[%s3013_s0 + $0x48] sm:$0xff]  ;;  %v54_v46 = vmul.f32 14.285714, %v38_v42  ;;  %v39_v50 = vld [vmem:[%s3013_s0 + $0x30] sm:$0xff]  ;;  %v1639_v9 = vmov 1.0   ;;  %vm192_vm3 = vcmp.eq.s32.totalorder %v153_v7, %v1768_v5 }
  0x13   :  { %v45_v36 = vld [vmem:[%s3013_s0 + $0x60] sm:$0xff]  ;;  %v57_v39 = vmul.f32 14.285714, %v41_v35  ;;  %v46_v44 = vld [vmem:[%s3013_s0 + $0x68] sm:$0xff]  ;;  %v58_v47 = vmul.f32 14.285714, %v42_v43 }
  0x14   :  { %84 = vmatpush.xpose.msra.mxu0 %v77_v10  ;;  %v61_v40 = vmul.f32 14.285714, %v45_v36  ;;  %v62_v48 = vmul.f32 14.285714, %v46_v44  ;;  %v43_v51 = vld [vmem:[%s3013_s0 + $0x50] sm:$0xff]  ;;  %v36_v57 = vld [vmem:[%s3013_s0 + $0x18] sm:$0xff] }
  0x15   :  { %1431 = vmatpush.xpose.msra.mxu1 %v77_v10  ;;  %1432 = vmatpush.xpose.msra.mxu2 %v77_v10  ;;  %v47_v52 = vld [vmem:[%s3013_s0 + $0x70] sm:$0xff]  ;;  %v51_v53 = vmul.f32 14.285714, %v35_v49  ;;  %v55_v54 = vmul.f32 14.285714, %v39_v50  ;;  %v40_v58 = vld [vmem:[%s3013_s0 + $0x38] sm:$0xff] }
  0x16   :  { %1433 = vmatpush.xpose.msra.mxu3 %v77_v10  ;;  %v59_v55 = vmul.f32 14.285714, %v43_v51  ;;  %v63_v56 = vmul.f32 14.285714, %v47_v52  ;;  %v44_v59 = vld [vmem:[%s3013_s0 + $0x58] sm:$0xff]  ;;  %v1782_v10 = vsel %vm189_vm0, 0.0, %v1639_v9 }
  0x17   :  { %258 = vperm.xlu1 %1478, %v226_v11   ;;  %v48_v60 = vld [vmem:[%s3013_s0 + $0x78] sm:$0xff]  ;;  %v52_v61 = vmul.f32 14.285714, %v36_v57  ;;  %v56_v62 = vmul.f32 14.285714, %v40_v58  ;;  %v155_v44 = vadd.s32 56, %v1766_v3 }
  0x18   :  { %255 = vperm.xlu0 %1477, %v225_v12   ;;  %85 = vmatpush.xpose.msra.mxu0 %v76_v13  ;;  %v60_v63 = vmul.f32 14.285714, %v44_v59  ;;  %v64_v0 = vmul.f32 14.285714, %v48_v60  ;;  %v1775_v8 = vld [vmem:[%s3016_s3] ss:$0 sm:$0xff] }
  0x19   :  { %1434 = vmatpush.xpose.msra.mxu1 %v76_v13  ;;  %1435 = vmatpush.xpose.msra.mxu2 %v76_v13  ;;  %v1785_v12 = vsel %vm187_vm1, 0.0, %v1639_v9  ;;  %vm194_vm0 = vcmp.eq.s32.totalorder %v155_v44, %v1768_v5 }
  0x1a   :  { %1436 = vmatpush.xpose.msra.mxu3 %v76_v13  ;;  %261 = vperm.xlu2 %1479, %v227_v14   ;;  %v151_v14 = vadd.s32 24, %v1766_v3  ;;  %v1880_v58 = vsel %vm194_vm0, 0.0, %v1639_v9 }
  0x1c   :  { %86 = vmatpush.xpose.msra.mxu0 %v75_v15  ;;  %vm190_vm7 = vcmp.eq.s32.totalorder %v151_v14, %v1768_v5  ;;  %v160_v14 = vadd.s32 96, %v1766_v3 }
  0x1d   :  { %1437 = vmatpush.xpose.msra.mxu1 %v75_v15  ;;  %1438 = vmatpush.xpose.msra.mxu2 %v75_v15 }
  0x1e   :  { %1439 = vmatpush.xpose.msra.mxu3 %v75_v15  ;;  %v149_v15 = vadd.s32 8, %v1766_v3 }
  0x1f   :  { %267 = vperm.xlu1 %1478, %v229_v16   ;;  %v1640_v16 = vmov 0.0  }
  0x20   :  { %264 = vperm.xlu0 %1477, %v228_v17   ;;  %87 = vmatpush.xpose.msra.mxu0 %v74_v18  ;;  %vm188_vm8 = vcmp.eq.s32.totalorder %v149_v15, %v1768_v5 }
  0x21   :  { %1440 = vmatpush.xpose.msra.mxu1 %v74_v18  ;;  %1441 = vmatpush.xpose.msra.mxu2 %v74_v18  ;;  %v1825_v32 = vsel %vm188_vm8, 0.0, %v1639_v9 }
  0x22   :  { %1442 = vmatpush.xpose.msra.mxu3 %v74_v18  ;;  %270 = vperm.xlu2 %1479, %v230_v19   ;;  %v1798_v19 = vsel %vm186_vm2, 1.0, %v1640_v16 }
  0x24   :  { %88 = vmatpush.xpose.msra.mxu0 %v73_v20 }
  0x25   :  { %1443 = vmatpush.xpose.msra.mxu1 %v73_v20  ;;  %1444 = vmatpush.xpose.msra.mxu2 %v73_v20 }
  0x26   :  { %1445 = vmatpush.xpose.msra.mxu3 %v73_v20 }
  0x27   :  { %276 = vperm.xlu1 %1478, %v232_v21   ;;  %v152_v21 = vadd.s32 32, %v1766_v3 }
  0x28   :  { %273 = vperm.xlu0 %1477, %v231_v22   ;;  %89 = vmatpush.xpose.msra.mxu0 %v72_v23 }
  0x29   :  { %1446 = vmatpush.xpose.msra.mxu1 %v72_v23  ;;  %1447 = vmatpush.xpose.msra.mxu2 %v72_v23  ;;  %vm191_vm9 = vcmp.eq.s32.totalorder %v152_v21, %v1768_v5 }
  0x2a   :  { %1448 = vmatpush.xpose.msra.mxu3 %v72_v23  ;;  %279 = vperm.xlu2 %1479, %v233_v24   ;;  %v1804_v24 = vsel %vm192_vm3, 0.0, %v1639_v9 }
  0x2c   :  { %90 = vmatpush.xpose.msra.mxu0 %v71_v25 }
  0x2d   :  { %1449 = vmatpush.xpose.msra.mxu1 %v71_v25  ;;  %1450 = vmatpush.xpose.msra.mxu2 %v71_v25 }
  0x2e   :  { %1451 = vmatpush.xpose.msra.mxu3 %v71_v25 }
  0x30   :  { %282 = vperm.xlu0 %1477, %v234_v26   ;;  %91 = vmatpush.xpose.msra.mxu0 %v70_v27 }
  0x31   :  { %1452 = vmatpush.xpose.msra.mxu1 %v70_v27  ;;  %1453 = vmatpush.xpose.msra.mxu2 %v70_v27 }
  0x32   :  { %1454 = vmatpush.xpose.msra.mxu3 %v70_v27 }
  0x34   :  { %92 = vmatpush.xpose.msra.mxu0 %v69_v28 }
  0x35   :  { %1455 = vmatpush.xpose.msra.mxu1 %v69_v28  ;;  %1456 = vmatpush.xpose.msra.mxu2 %v69_v28 }
  0x36   :  { %1457 = vmatpush.xpose.msra.mxu3 %v69_v28  ;;  %v156_v28 = vadd.s32 64, %v1766_v3 }
  0x38   :  { %93 = vmatpush.xpose.msra.mxu0 %v68_v29  ;;  %vm195_vm13 = vcmp.eq.s32.totalorder %v156_v28, %v1768_v5 }
  0x39   :  { %1458 = vmatpush.xpose.msra.mxu1 %v68_v29  ;;  %1459 = vmatpush.xpose.msra.mxu2 %v68_v29  ;;  %v1848_v42 = vsel %vm195_vm13, 0.0, %v1639_v9 }
  0x3a   :  { %1460 = vmatpush.xpose.msra.mxu3 %v68_v29 }
  0x3c   :  { %94 = vmatpush.xpose.msra.mxu0 %v67_v30 }
  0x3d   :  { %1461 = vmatpush.xpose.msra.mxu1 %v67_v30  ;;  %1462 = vmatpush.xpose.msra.mxu2 %v67_v30 }
  0x3e   :  { %1463 = vmatpush.xpose.msra.mxu3 %v67_v30  ;;  %v1822_v30 = vsel %vm190_vm7, 0.0, %v1639_v9 }
  0x40   :  { %95 = vmatpush.xpose.msra.mxu0 %v66_v31 }
  0x41   :  { %1464 = vmatpush.xpose.msra.mxu1 %v66_v31  ;;  %1465 = vmatpush.xpose.msra.mxu2 %v66_v31 }
  0x42   :  { %1466 = vmatpush.xpose.msra.mxu3 %v66_v31 }
  0x44   :  { %96 = vmatpush.xpose.msra.mxu0 %v65_v34 }
  0x45   :  { %1467 = vmatpush.xpose.msra.mxu1 %v65_v34  ;;  %1468 = vmatpush.xpose.msra.mxu2 %v65_v34 }
  0x46   :  { %1469 = vmatpush.xpose.msra.mxu3 %v65_v34  ;;  %v154_v34 = vadd.s32 48, %v1766_v3 }
  0x47   :  { %97 = vmatmul.f32.vlgmr.msra.gmra.mxu0 %v49_v37  ;;  %v1837_v37 = vsel %vm191_vm9, 0.0, %v1639_v9 }
  0x48   :  { %109 = vmatmul.f32.vlgmr.msra.gmra.mxu1 %v53_v38  ;;  %121 = vmatmul.f32.vlgmr.msra.gmra.mxu2 %v57_v39  ;;  %vm193_vm15 = vcmp.eq.s32.totalorder %v154_v34, %v1768_v5 }
  0x49   :  { %133 = vmatmul.f32.vlgmr.msra.gmra.mxu3 %v61_v40  ;;  %v1867_v52 = vsel %vm193_vm15, 0.0, %v1639_v9 }
  0x4f   :  { %100 = vmatmul.f32.gmra.mxu0 %v50_v45 }
  0x50   :  { %112 = vmatmul.f32.gmra.mxu1 %v54_v46  ;;  %124 = vmatmul.f32.gmra.mxu2 %v58_v47 }
  0x51   :  { %136 = vmatmul.f32.gmra.mxu3 %v62_v48  ;;  %v159_v48 = vadd.s32 88, %v1766_v3 }
  0x53   :  { %vm198_vm3 = vcmp.eq.s32.totalorder %v159_v48, %v1768_v5 }
  0x54   :  { %v1886_v60 = vsel %vm198_vm3, 0.0, %v1639_v9  ;;  %vm371_vm3 = vcmask 7168  }
  0x55   :  { %422 = vst.msk [vmem:[#allocation5 + $0x10] sm:$0xff] %vm371_vm3, %v1640_v16 }
  0x56   :  { %388 = vst.msk [vmem:[#allocation3] sm:$0xff] %vm371_vm3, %v1640_v16 }
  0x57   :  { %103 = vmatmul.f32.gmra.mxu0 %v51_v53  ;;  %389 = vst.msk [vmem:[#allocation3 + $0x8] sm:$0xff] %vm371_vm3, %v1640_v16 }
  0x58   :  { %115 = vmatmul.f32.gmra.mxu1 %v55_v54  ;;  %127 = vmatmul.f32.gmra.mxu2 %v59_v55  ;;  %v157_v54 = vadd.s32 72, %v1766_v3  ;;  %390 = vst.msk [vmem:[#allocation3 + $0x10] sm:$0xff] %vm371_vm3, %v1640_v16 }
  0x59   :  { %139 = vmatmul.f32.gmra.mxu3 %v63_v56  ;;  %391 = vst.msk [vmem:[#allocation3 + $0x18] sm:$0xff] %vm371_vm3, %v1640_v16 }
  0x5a   :  { %392 = vst.msk [vmem:[#allocation3 + $0x20] sm:$0xff] %vm371_vm3, %v1640_v16 }
  0x5b   :  { %393 = vst.msk [vmem:[#allocation3 + $0x28] sm:$0xff] %vm371_vm3, %v1640_v16 }
  0x5c   :  { %394 = vst.msk [vmem:[#allocation3 + $0x30] sm:$0xff] %vm371_vm3, %v1640_v16 }
  0x5d   :  { %395 = vst.msk [vmem:[#allocation3 + $0x38] sm:$0xff] %vm371_vm3, %v1640_v16 }
  0x5e   :  { %396 = vst.msk [vmem:[#allocation3 + $0x40] sm:$0xff] %vm371_vm3, %v1640_v16 }
  0x5f   :  { %106 = vmatmul.f32.gmra.mxu0 %v52_v61  ;;  %397 = vst.msk [vmem:[#allocation3 + $0x48] sm:$0xff] %vm371_vm3, %v1640_v16 }
  0x60   :  { %118 = vmatmul.f32.gmra.mxu1 %v56_v62  ;;  %130 = vmatmul.f32.gmra.mxu2 %v60_v63  ;;  %398 = vst.msk [vmem:[#allocation3 + $0x50] sm:$0xff] %vm371_vm3, %v1640_v16 }
  0x61   :  { %142 = vmatmul.f32.gmra.mxu3 %v64_v0  ;;  %v162_v0 = vadd.s32 112, %v1766_v3  ;;  %399 = vst.msk [vmem:[#allocation3 + $0x58] sm:$0xff] %vm371_vm3, %v1640_v16 }
  0x62   :  { %400 = vst.msk [vmem:[#allocation3 + $0x60] sm:$0xff] %vm371_vm3, %v1640_v16 }
  0x63   :  { %vm201_vm8 = vcmp.eq.s32.totalorder %v162_v0, %v1768_v5  ;;  %401 = vst.msk [vmem:[#allocation3 + $0x68] sm:$0xff] %vm371_vm3, %v1640_v16 }
  0x64   :  { %v250_v1 = vpop.permute.xlu2 %249  ;;  %v1919_v21 = vsel %vm201_vm8, 0.0, %v1639_v9  ;;  %402 = vst.msk [vmem:[#allocation3 + $0x70] sm:$0xff] %vm371_vm3, %v1640_v16 }
  0x65   :  { %vm289_vm10 = vcmp.eq.s32.totalorder %v250_v1, %v1775_v8  ;;  %403 = vst.msk [vmem:[#allocation3 + $0x78] sm:$0xff] %vm371_vm3, %v1640_v16 }
  0x66   :  { %v1409_v41 = vsel %vm289_vm10, 1.0, %v1640_v16  ;;  %404 = vst.msk [vmem:[#allocation4] sm:$0xff] %vm371_vm3, %v1640_v16 }
  0x67   :  { %v337_v50 = vmul.f32 %v1409_v41, %v1837_v37  ;;  %405 = vst.msk [vmem:[#allocation4 + $0x8] sm:$0xff] %vm371_vm3, %v1640_v16 }
  0x68   :  { %406 = vst.msk [vmem:[#allocation4 + $0x10] sm:$0xff] %vm371_vm3, %v1640_v16 }
  0x69   :  { %v1883_v59 = vmul.f32 %v1798_v19, %v337_v50  ;;  %407 = vst.msk [vmem:[#allocation4 + $0x18] sm:$0xff] %vm371_vm3, %v1640_v16 }
  0x6a   :  { %408 = vst.msk [vmem:[#allocation4 + $0x20] sm:$0xff] %vm371_vm3, %v1640_v16 }
  0x6b   :  { %409 = vst.msk [vmem:[#allocation4 + $0x28] sm:$0xff] %vm371_vm3, %v1640_v16 }
  0x6c   :  { %v253_v4 = vpop.permute.xlu2 %252  ;;  %410 = vst.msk [vmem:[#allocation4 + $0x30] sm:$0xff] %vm371_vm3, %v1640_v16 }
  0x6d   :  { %vm290_vm6 = vcmp.eq.s32.totalorder %v253_v4, %v1775_v8  ;;  %v158_v4 = vadd.s32 80, %v1766_v3  ;;  %411 = vst.msk [vmem:[#allocation4 + $0x38] sm:$0xff] %vm371_vm3, %v1640_v16 }
  0x6e   :  { %v1410_v25 = vsel %vm290_vm6, 1.0, %v1640_v16  ;;  %vm196_vm6 = vcmp.eq.s32.totalorder %v157_v54, %v1768_v5  ;;  %412 = vst.msk [vmem:[#allocation4 + $0x40] sm:$0xff] %vm371_vm3, %v1640_v16 }
  0x6f   :  { %v338_v29 = vmul.f32 %v1410_v25, %v1804_v24  ;;  %vm197_vm10 = vcmp.eq.s32.totalorder %v158_v4, %v1768_v5  ;;  %413 = vst.msk [vmem:[#allocation4 + $0x48] sm:$0xff] %vm371_vm3, %v1640_v16 }
  0x70   :  { %v1927_v25 = vsel %vm197_vm10, 0.0, %v1639_v9  ;;  %414 = vst.msk [vmem:[#allocation4 + $0x50] sm:$0xff] %vm371_vm3, %v1640_v16 }
  0x71   :  { %v1842_v40 = vmul.f32 %v1798_v19, %v338_v29  ;;  %415 = vst.msk [vmem:[#allocation4 + $0x58] sm:$0xff] %vm371_vm3, %v1640_v16 }
  0x72   :  { %416 = vst.msk [vmem:[#allocation4 + $0x60] sm:$0xff] %vm371_vm3, %v1640_v16 }
  0x73   :  { %417 = vst.msk [vmem:[#allocation4 + $0x68] sm:$0xff] %vm371_vm3, %v1640_v16 }
  0x74   :  { %v262_v20 = vpop.permute.xlu2 %261  ;;  %418 = vst.msk [vmem:[#allocation4 + $0x70] sm:$0xff] %vm371_vm3, %v1640_v16 }
  0x75   :  { %vm293_vm14 = vcmp.eq.s32.totalorder %v262_v20, %v1775_v8  ;;  %419 = vst.msk [vmem:[#allocation4 + $0x78] sm:$0xff] %vm371_vm3, %v1640_v16 }
  0x76   :  { %v1413_v43 = vsel %vm293_vm14, 1.0, %v1640_v16  ;;  %420 = vst.msk [vmem:[#allocation5] sm:$0xff] %vm371_vm3, %v1640_v16 }
  0x77   :  { %v341_v49 = vmul.f32 %v1413_v43, %v1848_v42  ;;  %421 = vst.msk [vmem:[#allocation5 + $0x8] sm:$0xff] %vm371_vm3, %v1640_v16 }
  0x78   :  { %423 = vst.msk [vmem:[#allocation5 + $0x18] sm:$0xff] %vm371_vm3, %v1640_v16 }
  0x79   :  { %v244_v11 = vpop.permute.xlu1 %243  ;;  %v1877_v57 = vmul.f32 %v1798_v19, %v341_v49  ;;  %424 = vst.msk [vmem:[#allocation5 + $0x20] sm:$0xff] %vm371_vm3, %v1640_v16 }
  0x7a   :  { %v238_v13 = vpop.permute.xlu0 %237  ;;  %vm287_vm4 = vcmp.eq.s32.totalorder %v244_v11, %v1775_v8  ;;  %v1902_v11 = vsel %vm196_vm6, 0.0, %v1639_v9  ;;  %425 = vst.msk [vmem:[#allocation5 + $0x28] sm:$0xff] %vm371_vm3, %v1640_v16 }
  0x7b   :  { %vm285_vm5 = vcmp.eq.s32.totalorder %v238_v13, %v1775_v8  ;;  %v1407_v17 = vsel %vm287_vm4, 1.0, %v1640_v16  ;;  %426 = vst.msk [vmem:[#allocation5 + $0x30] sm:$0xff] %vm371_vm3, %v1640_v16 }
  0x7c   :  { %v1405_v18 = vsel %vm285_vm5, 1.0, %v1640_v16  ;;  %v335_v22 = vmul.f32 %v1407_v17, %v1782_v10  ;;  %v271_v45 = vpop.permute.xlu2 %270  ;;  %427 = vst.msk [vmem:[#allocation5 + $0x38] sm:$0xff] %vm371_vm3, %v1640_v16 }
  0x7d   :  { %v333_v23 = vmul.f32 %v1405_v18, %v1785_v12  ;;  %vm296_vm4 = vcmp.eq.s32.totalorder %v271_v45, %v1775_v8  ;;  %428 = vst.msk [vmem:[#allocation5 + $0x40] sm:$0xff] %vm371_vm3, %v1640_v16 }
  0x7e   :  { %v1809_v26 = vmul.f32 %v1798_v19, %v335_v22  ;;  %v1416_v61 = vsel %vm296_vm4, 1.0, %v1640_v16  ;;  %429 = vst.msk [vmem:[#allocation5 + $0x48] sm:$0xff] %vm371_vm3, %v1640_v16 }
  0x7f   :  { %v1812_v27 = vmul.f32 %v1798_v19, %v333_v23  ;;  %v344_v2 = vmul.f32 %v1416_v61, %v1886_v60  ;;  %430 = vst.msk [vmem:[#allocation5 + $0x50] sm:$0xff] %vm371_vm3, %v1640_v16 }
  0x80   :  { %921 = vadd.xlane.f32.xlu1 %v1809_v26  ;;  %431 = vst.msk [vmem:[#allocation5 + $0x58] sm:$0xff] %vm371_vm3, %v1640_v16 }
  0x81   :  { %917 = vadd.xlane.f32.xlu0 %v1812_v27  ;;  %v247_v31 = vpop.permute.xlu1 %246  ;;  %v1912_v18 = vmul.f32 %v1798_v19, %v344_v2  ;;  %432 = vst.msk [vmem:[#allocation5 + $0x60] sm:$0xff] %vm371_vm3, %v1640_v16 }
  0x82   :  { %v241_v33 = vpop.permute.xlu0 %240  ;;  %vm288_vm11 = vcmp.eq.s32.totalorder %v247_v31, %v1775_v8  ;;  %v161_v31 = vadd.s32 104, %v1766_v3  ;;  %433 = vst.msk [vmem:[#allocation5 + $0x68] sm:$0xff] %vm371_vm3, %v1640_v16 }
  0x83   :  { %vm286_vm12 = vcmp.eq.s32.totalorder %v241_v33, %v1775_v8  ;;  %v1408_v35 = vsel %vm288_vm11, 1.0, %v1640_v16  ;;  %434 = vst.msk [vmem:[#allocation5 + $0x70] sm:$0xff] %vm371_vm3, %v1640_v16 }
  0x84   :  { %v1406_v36 = vsel %vm286_vm12, 1.0, %v1640_v16  ;;  %v336_v38 = vmul.f32 %v1408_v35, %v1822_v30  ;;  %v280_v1 = vpop.permute.xlu2 %279  ;;  %vm199_vm12 = vcmp.eq.s32.totalorder %v160_v14, %v1768_v5  ;;  %vm200_vm14 = vcmp.eq.s32.totalorder %v161_v31, %v1768_v5  ;;  %435 = vst.msk [vmem:[#allocation5 + $0x78] sm:$0xff] %vm371_vm3, %v1640_v16 }
  0x85   :  { %v334_v39 = vmul.f32 %v1406_v36, %v1825_v32  ;;  %vm299_vm9 = vcmp.eq.s32.totalorder %v280_v1, %v1775_v8  ;;  %v1936_v33 = vsel %vm199_vm12, 0.0, %v1639_v9  ;;  %v163_v36 = vadd.s32 120, %v1766_v3 }
  0x86   :  { %v1853_v46 = vmul.f32 %v1798_v19, %v336_v38  ;;  %v1419_v22 = vsel %vm299_vm9, 1.0, %v1640_v16  ;;  %v1952_v3 = vsel %vm200_vm14, 0.0, %v1639_v9 }
  0x87   :  { %v1856_v47 = vmul.f32 %v1798_v19, %v334_v39  ;;  %v347_v29 = vmul.f32 %v1419_v22, %v1919_v21  ;;  %vm202_vm0 = vcmp.eq.s32.totalorder %v163_v36, %v1768_v5 }
  0x88   :  { %927 = vadd.xlane.f32.xlu1 %v1842_v40  ;;  %v1957_v49 = vsel %vm202_vm0, 0.0, %v1639_v9 }
  0x89   :  { %923 = vadd.xlane.f32.xlu0 %v1853_v46  ;;  %919 = vadd.xlane.f32.xlu2 %v1856_v47  ;;  %v259_v51 = vpop.permute.xlu1 %258  ;;  %v1944_v43 = vmul.f32 %v1798_v19, %v347_v29 }
  0x8a   :  { %v256_v53 = vpop.permute.xlu0 %255  ;;  %vm292_vm5 = vcmp.eq.s32.totalorder %v259_v51, %v1775_v8 }
  0x8b   :  { %vm291_vm1 = vcmp.eq.s32.totalorder %v256_v53, %v1775_v8  ;;  %v1412_v62 = vsel %vm292_vm5, 1.0, %v1640_v16 }
  0x8c   :  { %v1411_v55 = vsel %vm291_vm1, 1.0, %v1640_v16  ;;  %v340_v6 = vmul.f32 %v1412_v62, %v1880_v58 }
  0x8d   :  { %v339_v56 = vmul.f32 %v1411_v55, %v1867_v52 }
  0x8e   :  { %v1916_v20 = vmul.f32 %v1798_v19, %v340_v6 }
  0x8f   :  { %v1891_v63 = vmul.f32 %v1798_v19, %v339_v56 }
  0x90   :  { %933 = vadd.xlane.f32.xlu1 %v1877_v57 }
  0x91   :  { %929 = vadd.xlane.f32.xlu0 %v1891_v63  ;;  %925 = vadd.xlane.f32.xlu2 %v1883_v59  ;;  %v268_v7 = vpop.permute.xlu1 %267 }
  0x92   :  { %v265_v13 = vpop.permute.xlu0 %264  ;;  %vm295_vm11 = vcmp.eq.s32.totalorder %v268_v7, %v1775_v8 }
  0x93   :  { %vm294_vm7 = vcmp.eq.s32.totalorder %v265_v13, %v1775_v8  ;;  %v1415_v28 = vsel %vm295_vm11, 1.0, %v1640_v16 }
  0x94   :  { %v1414_v15 = vsel %vm294_vm7, 1.0, %v1640_v16  ;;  %v343_v38 = vmul.f32 %v1415_v28, %v1927_v25 }
  0x95   :  { %v342_v17 = vmul.f32 %v1414_v15, %v1902_v11 }
  0x96   :  { %v361_v45 = vmul.f32 %v1798_v19, %v343_v38 }
  0x97   :  { %v1923_v23 = vmul.f32 %v1798_v19, %v342_v17 }
  0x98   :  { %939 = vadd.xlane.f32.xlu1 %v1912_v18 }
  0x99   :  { %935 = vadd.xlane.f32.xlu0 %v1923_v23  ;;  %931 = vadd.xlane.f32.xlu2 %v1916_v20  ;;  %v277_v35 = vpop.permute.xlu1 %276 }
  0x9a   :  { %v274_v34 = vpop.permute.xlu0 %273  ;;  %vm298_vm15 = vcmp.eq.s32.totalorder %v277_v35, %v1775_v8 }
  0x9b   :  { %vm297_vm13 = vcmp.eq.s32.totalorder %v274_v34, %v1775_v8  ;;  %v1418_v48 = vsel %vm298_vm15, 1.0, %v1640_v16 }
  0x9c   :  { %v1417_v39 = vsel %vm297_vm13, 1.0, %v1640_v16  ;;  %v346_v51 = vmul.f32 %v1418_v48, %v1952_v3 }
  0x9d   :  { %v345_v41 = vmul.f32 %v1417_v39, %v1936_v33 }
  0x9e   :  { %v364_v56 = vmul.f32 %v1798_v19, %v346_v51 }
  0x9f   :  { %v363_v44 = vmul.f32 %v1798_v19, %v345_v41 }
  0xa0   :  { %945 = vadd.xlane.f32.xlu1 %v1944_v43 }
  0xa1   :  { %941 = vadd.xlane.f32.xlu0 %v363_v44  ;;  %937 = vadd.xlane.f32.xlu2 %v361_v45 }
  0xa2   :  { %v283_v50 = vpop.permute.xlu0 %282 }
  0xa3   :  { %vm300_vm1 = vcmp.eq.s32.totalorder %v283_v50, %v1775_v8 }
  0xa4   :  { %v1420_v53 = vsel %vm300_vm1, 1.0, %v1640_v16 }
  0xa5   :  { %v348_v54 = vmul.f32 %v1420_v53, %v1957_v49 }
  0xa7   :  { %v1964_v55 = vmul.f32 %v1798_v19, %v348_v54 }
  0xa9   :  { %947 = vadd.xlane.f32.xlu0 %v1964_v55  ;;  %943 = vadd.xlane.f32.xlu2 %v364_v56 }
  0xc4   :  { %v98_v61 = vpop.f32.mrf.mxu0 }
  0xc5   :  { %v1970_v9 = vsel %vm186_vm2, %v98_v61, -inf  ;;  %v821_v8 = vmul.f32 %v1812_v27, %v98_v61  ;;  %v110_v62 = vpop.f32.mrf.mxu1 }
  0xc6   :  { %468 = vmax.xlane.f32.xlu1 %v1970_v9  ;;  %v1976_v2 = vsel %vm186_vm2, %v110_v62, -inf  ;;  %v825_v15 = vmul.f32 %v1883_v59, %v110_v62 }
  0xc7   :  { %837 = vadd.xlane.f32.xlu2 %v821_v8  ;;  %v901_v8 = vld [vmem:[#allocation5] sm:$0xff] }
  0xcb   :  { %v122_v0 = vpop.f32.mrf.mxu2 }
  0xcc   :  { %v134_v1 = vpop.f32.mrf.mxu3  ;;  %v1984_v4 = vsel %vm186_vm2, %v122_v0, -inf  ;;  %v829_v22 = vmul.f32 %v1877_v57, %v122_v0 }
  0xcd   :  { %v1980_v19 = vsel %vm186_vm2, %v134_v1, -inf  ;;  %v1986_v6 = vmul.f32 %v363_v44, %v134_v1  ;;  %v113_v27 = vpop.f32.mrf.mxu1 }
  0xce   :  { %492 = vmax.xlane.f32.xlu0 %v1980_v19  ;;  %476 = vmax.xlane.f32.xlu1 %v1976_v2  ;;  %v826_v14 = vmul.f32 %v1842_v40, %v113_v27  ;;  %v101_v40 = vpop.f32.mrf.mxu0 }
  0xcf   :  { %484 = vmax.xlane.f32.xlu2 %v1984_v4  ;;  %v822_v29 = vmul.f32 %v1856_v47, %v101_v40  ;;  %v2027_v31 = vsel %vm186_vm2, %v101_v40, -inf  ;;  %v904_v40 = vld [vmem:[#allocation5 + $0x18] sm:$0xff] }
  0xd3   :  { %v125_v7 = vpop.f32.mrf.mxu2 }
  0xd4   :  { %v137_v13 = vpop.f32.mrf.mxu3  ;;  %v2018_v57 = vsel %vm186_vm2, %v125_v7, -inf  ;;  %v830_v48 = vmul.f32 %v1923_v23, %v125_v7  ;;  %v903_v23 = vld [vmem:[#allocation5 + $0x10] sm:$0xff]  ;;  %v906_v7 = vld [vmem:[#allocation5 + $0x28] sm:$0xff] }
  0xd5   :  { %v2003_v17 = vmul.f32 %v364_v56, %v137_v13  ;;  %v2056_v39 = vsel %vm186_vm2, %v137_v13, -inf  ;;  %v116_v44 = vpop.f32.mrf.mxu1  ;;  %v902_v13 = vld [vmem:[#allocation5 + $0x8] sm:$0xff] }
  0xd6   :  { %847 = vadd.xlane.f32.xlu0 %v826_v14  ;;  %845 = vadd.xlane.f32.xlu1 %v825_v15  ;;  %v104_v47 = vpop.f32.mrf.mxu0  ;;  %v827_v50 = vmul.f32 %v1891_v63, %v116_v44 }
  0xd7   :  { %853 = vadd.xlane.f32.xlu2 %v829_v22  ;;  %v2050_v36 = vsel %vm186_vm2, %v104_v47, -inf  ;;  %v823_v53 = vmul.f32 %v1809_v26, %v104_v47  ;;  %v909_v47 = vld [vmem:[#allocation5 + $0x40] sm:$0xff] }
  0xdb   :  { %v128_v59 = vpop.f32.mrf.mxu2 }
  0xdc   :  { %v140_v28 = vpop.f32.mrf.mxu3  ;;  %v2034_v35 = vmul.f32 %v361_v45, %v128_v59  ;;  %v2084_v45 = vsel %vm186_vm2, %v116_v44, -inf  ;;  %v2112_v54 = vsel %vm186_vm2, %v128_v59, -inf  ;;  %v905_v44 = vld [vmem:[#allocation5 + $0x20] sm:$0xff] }
  0xdd   :  { %v2032_v34 = vmul.f32 %v1944_v43, %v140_v28  ;;  %v2071_v43 = vsel %vm186_vm2, %v113_v27, -inf  ;;  %v2118_v56 = vsel %vm186_vm2, %v140_v28, -inf  ;;  %v119_v61 = vpop.f32.mrf.mxu1 }
  0xde   :  { %486 = vmax.xlane.f32.xlu0 %v2018_v57  ;;  %839 = vadd.xlane.f32.xlu1 %v822_v29  ;;  %v107_v26 = vpop.f32.mrf.mxu0  ;;  %v2141_v27 = vsel %vm186_vm2, %v119_v61, -inf }
  0xdf   :  { %470 = vmax.xlane.f32.xlu2 %v2027_v31  ;;  %v2147_v15 = vsel %vm186_vm2, %v107_v26, -inf  ;;  %v824_v16 = vmul.f32 %v1853_v46, %v107_v26 }
  0xe4   :  { %v143_v38 = vpop.f32.mrf.mxu3 }
  0xe5   :  { %v2061_v41 = vmul.f32 %v1964_v55, %v143_v38  ;;  %v2135_v62 = vsel %vm186_vm2, %v143_v38, -inf  ;;  %v907_v38 = vld [vmem:[#allocation5 + $0x30] sm:$0xff] }
  0xe6   :  { %472 = vmax.xlane.f32.xlu0 %v2050_v36  ;;  %494 = vmax.xlane.f32.xlu1 %v2056_v39 }
  0xe7   :  { %478 = vmax.xlane.f32.xlu2 %v2071_v43 }
  0xee   :  { %480 = vmax.xlane.f32.xlu0 %v2084_v45  ;;  %855 = vadd.xlane.f32.xlu1 %v830_v48 }
  0xef   :  { %849 = vadd.xlane.f32.xlu2 %v827_v50 }
  0xf3   :  { %v922_v63 = vpop.xlane.xlu1 %921 }
  0xf4   :  { %v918_v51 = vpop.xlane.xlu0 %917  ;;  %v951_v55 = vadd.f32 %v922_v63, %v903_v23  ;;  %v828_v23 = vmul.f32 %v1916_v20, %v119_v61  ;;  %v908_v20 = vld [vmem:[#allocation5 + $0x38] sm:$0xff]  ;;  %v910_v61 = vld [vmem:[#allocation5 + $0x48] sm:$0xff] }
  0xf5   :  { %v949_v22 = vadd.f32 %v918_v51, %v901_v8  ;;  %v912_v8 = vld [vmem:[#allocation5 + $0x58] sm:$0xff] }
  0xf6   :  { %841 = vadd.xlane.f32.xlu0 %v823_v53  ;;  %967 = vst.msk [vmem:[#allocation5 + $0x10] sm:$0xff] %vm371_vm3, %v951_v55  ;;  %488 = vmax.xlane.f32.xlu1 %v2112_v54 }
  0xf7   :  { %496 = vmax.xlane.f32.xlu2 %v2118_v56  ;;  %965 = vst.msk [vmem:[#allocation5] sm:$0xff] %vm371_vm3, %v949_v22 }
  0xfb   :  { %v928_v0 = vpop.xlane.xlu1 %927 }
  0xfc   :  { %v924_v1 = vpop.xlane.xlu0 %923  ;;  %v920_v14 = vpop.xlane.xlu2 %919  ;;  %v954_v59 = vadd.f32 %v928_v0, %v906_v7 }
  0xfd   :  { %v950_v28 = vadd.f32 %v920_v14, %v902_v13  ;;  %v952_v29 = vadd.f32 %v924_v1, %v904_v40  ;;  %v2169_v0 = vpop.f32.mrf.mxu2  ;;  %v915_v40 = vld [vmem:[#allocation5 + $0x70] sm:$0xff] }
  0xfe   :  { %498 = vmax.xlane.f32.xlu0 %v2135_v62  ;;  %482 = vmax.xlane.f32.xlu1 %v2141_v27  ;;  %970 = vst.msk [vmem:[#allocation5 + $0x28] sm:$0xff] %vm371_vm3, %v954_v59  ;;  %v2174_v46 = vsel %vm186_vm2, %v2169_v0, -inf  ;;  %v913_v59 = vld [vmem:[#allocation5 + $0x60] sm:$0xff] }
  0xff   :  { %474 = vmax.xlane.f32.xlu2 %v2147_v15  ;;  %966 = vst.msk [vmem:[#allocation5 + $0x8] sm:$0xff] %vm371_vm3, %v950_v28  ;;  %v911_v28 = vld [vmem:[#allocation5 + $0x50] sm:$0xff] }
 0x100   :  { %968 = vst.msk [vmem:[#allocation5 + $0x18] sm:$0xff] %vm371_vm3, %v952_v29 }
 0x103   :  { %v934_v48 = vpop.xlane.xlu1 %933 }
 0x104   :  { %v930_v50 = vpop.xlane.xlu0 %929  ;;  %v957_v63 = vadd.f32 %v934_v48, %v909_v47  ;;  %v926_v51 = vpop.xlane.xlu2 %925 }
 0x105   :  { %v955_v53 = vadd.f32 %v930_v50, %v907_v38  ;;  %v953_v55 = vadd.f32 %v926_v51, %v905_v44  ;;  %v1641_v38 = vmov -inf  }
 0x106   :  { %973 = vst.msk [vmem:[#allocation5 + $0x40] sm:$0xff] %vm371_vm3, %v957_v63  ;;  %851 = vadd.xlane.f32.xlu1 %v828_v23  ;;  %v916_v23 = vld [vmem:[#allocation5 + $0x78] sm:$0xff]  ;;  %v914_v63 = vld [vmem:[#allocation5 + $0x68] sm:$0xff] }
 0x107   :  { %969 = vst.msk [vmem:[#allocation5 + $0x20] sm:$0xff] %vm371_vm3, %v953_v55  ;;  %843 = vadd.xlane.f32.xlu2 %v824_v16 }
 0x108   :  { %971 = vst.msk [vmem:[#allocation5 + $0x30] sm:$0xff] %vm371_vm3, %v955_v53 }
 0x109   :  { %372 = vst.msk [vmem:[#allocation2] sm:$0xff] %vm371_vm3, %v1641_v38 }
 0x10a   :  { %373 = vst.msk [vmem:[#allocation2 + $0x8] sm:$0xff] %vm371_vm3, %v1641_v38 }
 0x10b   :  { %v940_v1 = vpop.xlane.xlu1 %939  ;;  %374 = vst.msk [vmem:[#allocation2 + $0x10] sm:$0xff] %vm371_vm3, %v1641_v38 }
 0x10c   :  { %v936_v7 = vpop.xlane.xlu0 %935  ;;  %v960_v13 = vadd.f32 %v940_v1, %v912_v8  ;;  %v932_v14 = vpop.xlane.xlu2 %931  ;;  %375 = vst.msk [vmem:[#allocation2 + $0x18] sm:$0xff] %vm371_vm3, %v1641_v38 }
 0x10d   :  { %v956_v26 = vadd.f32 %v932_v14, %v908_v20  ;;  %v958_v22 = vadd.f32 %v936_v7, %v910_v61  ;;  %376 = vst.msk [vmem:[#allocation2 + $0x20] sm:$0xff] %vm371_vm3, %v1641_v38  ;;  %v805_v20 = vld [vmem:[#allocation4] sm:$0xff]  ;;  %v811_v14 = vld [vmem:[#allocation4 + $0x30] sm:$0xff] }
 0x10e   :  { %976 = vst.msk [vmem:[#allocation5 + $0x58] sm:$0xff] %vm371_vm3, %v960_v13 }
 0x10f   :  { %972 = vst.msk [vmem:[#allocation5 + $0x38] sm:$0xff] %vm371_vm3, %v956_v26  ;;  %490 = vmax.xlane.f32.xlu2 %v2174_v46 }
 0x110   :  { %974 = vst.msk [vmem:[#allocation5 + $0x48] sm:$0xff] %vm371_vm3, %v958_v22  ;;  %v2201_v8 = vld [vmem:[#allocation2] sm:$0xff] }
 0x111   :  { %377 = vst.msk [vmem:[#allocation2 + $0x28] sm:$0xff] %vm371_vm3, %v1641_v38 }
 0x112   :  { %378 = vst.msk [vmem:[#allocation2 + $0x30] sm:$0xff] %vm371_vm3, %v1641_v38 }
 0x113   :  { %v946_v29 = vpop.xlane.xlu1 %945  ;;  %379 = vst.msk [vmem:[#allocation2 + $0x38] sm:$0xff] %vm371_vm3, %v1641_v38 }
 0x114   :  { %v942_v47 = vpop.xlane.xlu0 %941  ;;  %v963_v5 = vadd.f32 %v946_v29, %v915_v40  ;;  %v938_v44 = vpop.xlane.xlu2 %937  ;;  %380 = vst.msk [vmem:[#allocation2 + $0x40] sm:$0xff] %vm371_vm3, %v1641_v38  ;;  %v2214_v22 = vld [vmem:[#allocation2 + $0x20] sm:$0xff] }
 0x115   :  { %v961_v48 = vadd.f32 %v942_v47, %v913_v59  ;;  %v959_v50 = vadd.f32 %v938_v44, %v911_v28  ;;  %381 = vst.msk [vmem:[#allocation2 + $0x48] sm:$0xff] %vm371_vm3, %v1641_v38 }
 0x116   :  { %979 = vst.msk [vmem:[#allocation5 + $0x70] sm:$0xff] %vm371_vm3, %v963_v5 }
 0x117   :  { %975 = vst.msk [vmem:[#allocation5 + $0x50] sm:$0xff] %vm371_vm3, %v959_v50 }
 0x118   :  { %977 = vst.msk [vmem:[#allocation5 + $0x60] sm:$0xff] %vm371_vm3, %v961_v48 }
 0x119   :  { %382 = vst.msk [vmem:[#allocation2 + $0x50] sm:$0xff] %vm371_vm3, %v1641_v38 }
 0x11a   :  { %383 = vst.msk [vmem:[#allocation2 + $0x58] sm:$0xff] %vm371_vm3, %v1641_v38 }
 0x11b   :  { %384 = vst.msk [vmem:[#allocation2 + $0x60] sm:$0xff] %vm371_vm3, %v1641_v38  ;;  %v2216_v59 = vld [vmem:[#allocation2 + $0x40] sm:$0xff] }
 0x11c   :  { %v948_v51 = vpop.xlane.xlu0 %947  ;;  %v944_v53 = vpop.xlane.xlu2 %943  ;;  %385 = vst.msk [vmem:[#allocation2 + $0x68] sm:$0xff] %vm371_vm3, %v1641_v38 }
 0x11d   :  { %v964_v16 = vadd.f32 %v948_v51, %v916_v23  ;;  %v962_v55 = vadd.f32 %v944_v53, %v914_v63  ;;  %386 = vst.msk [vmem:[#allocation2 + $0x70] sm:$0xff] %vm371_vm3, %v1641_v38  ;;  %v810_v23 = vld [vmem:[#allocation4 + $0x28] sm:$0xff]  ;;  %v809_v63 = vld [vmem:[#allocation4 + $0x20] sm:$0xff] }
 0x11e   :  { %387 = vst.msk [vmem:[#allocation2 + $0x78] sm:$0xff] %vm371_vm3, %v1641_v38  ;;  %v813_v53 = vld [vmem:[#allocation4 + $0x40] sm:$0xff] }
 0x11f   :  { %980 = vst.msk [vmem:[#allocation5 + $0x78] sm:$0xff] %vm371_vm3, %v964_v16 }
 0x120   :  { %978 = vst.msk [vmem:[#allocation5 + $0x68] sm:$0xff] %vm371_vm3, %v962_v55 }
 0x122   :  { %v2212_v26 = vld [vmem:[#allocation2 + $0x60] sm:$0xff] }
 0x139   :  { %v469_v61 = vpop.xlane.xlu1 %468 }
 0x13a   :  { %v2204_v1 = vmax.f32 %v2201_v8, %v469_v61  ;;  %v838_v7 = vpop.xlane.xlu2 %837 }
 0x13b   :  { %v869_v13 = vadd.f32 %v838_v7, %v805_v20 }
 0x13c   :  { %981 = vst.msk [vmem:[#allocation2] sm:$0xff] %vm371_vm3, %v2204_v1  ;;  %566 = vperm.xlu1 %1478, %v2204_v1  }
 0x13d   :  { %885 = vst.msk [vmem:[#allocation4] sm:$0xff] %vm371_vm3, %v869_v13  ;;  %v2245_v13 = vld [vmem:[#allocation2 + $0x48] sm:$0xff] }
 0x13e   :  { %3039 = vst [vmem:[#allocation9_spill] sm:$0xff] %v2245_v13 }
 0x141   :  { %v493_v40 = vpop.xlane.xlu0 %492  ;;  %v477_v29 = vpop.xlane.xlu1 %476 }
 0x142   :  { %v2219_v28 = vmax.f32 %v2212_v26, %v493_v40  ;;  %v2222_v47 = vmax.f32 %v2214_v22, %v477_v29  ;;  %v485_v38 = vpop.xlane.xlu2 %484  ;;  %v806_v40 = vld [vmem:[#allocation4 + $0x8] sm:$0xff] }
 0x143   :  { %v2229_v44 = vmax.f32 %v2216_v59, %v485_v38  ;;  %v2247_v38 = vld [vmem:[#allocation2 + $0x8] sm:$0xff] }
 0x144   :  { %993 = vst.msk [vmem:[#allocation2 + $0x60] sm:$0xff] %vm371_vm3, %v2219_v28  ;;  %626 = vperm.xlu1 %1478, %v2219_v28   ;;  %586 = vperm.xlu0 %1477, %v2222_v47  }
 0x145   :  { %985 = vst.msk [vmem:[#allocation2 + $0x20] sm:$0xff] %vm371_vm3, %v2222_v47  ;;  %606 = vperm.xlu2 %1479, %v2229_v44  }
 0x146   :  { %989 = vst.msk [vmem:[#allocation2 + $0x40] sm:$0xff] %vm371_vm3, %v2229_v44 }
 0x149   :  { %v848_v51 = vpop.xlane.xlu0 %847  ;;  %v846_v55 = vpop.xlane.xlu1 %845 }
 0x14a   :  { %v874_v16 = vadd.f32 %v848_v51, %v810_v23  ;;  %v873_v20 = vadd.f32 %v846_v55, %v809_v63  ;;  %v854_v61 = vpop.xlane.xlu2 %853 }
 0x14b   :  { %v877_v7 = vadd.f32 %v854_v61, %v813_v53  ;;  %v2268_v61 = vld [vmem:[#allocation2 + $0x68] sm:$0xff] }
 0x14c   :  { %890 = vst.msk [vmem:[#allocation4 + $0x28] sm:$0xff] %vm371_vm3, %v874_v16 }
 0x14d   :  { %889 = vst.msk [vmem:[#allocation4 + $0x20] sm:$0xff] %vm371_vm3, %v873_v20  ;;  %v2266_v20 = vld [vmem:[#allocation2 + $0x10] sm:$0xff] }
 0x14e   :  { %893 = vst.msk [vmem:[#allocation4 + $0x40] sm:$0xff] %vm371_vm3, %v877_v7 }
 0x14f   :  { %3042 = vst [vmem:[#allocation12_spill] sm:$0xff] %v2266_v20 }
 0x150   :  { %3043 = vst [vmem:[#allocation13_spill] sm:$0xff] %v2268_v61 }
 0x151   :  { %v487_v29 = vpop.xlane.xlu0 %486  ;;  %v840_v23 = vpop.xlane.xlu1 %839 }
 0x152   :  { %v2250_v48 = vmax.f32 %v2245_v13, %v487_v29  ;;  %v870_v51 = vadd.f32 %v840_v23, %v806_v40  ;;  %v471_v63 = vpop.xlane.xlu2 %470  ;;  %v2270_v40 = vld [vmem:[#allocation2 + $0x28] sm:$0xff] }
 0x153   :  { %v2258_v53 = vmax.f32 %v2247_v38, %v471_v63 }
 0x154   :  { %3040 = vst [vmem:[#allocation10_spill] sm:$0xff] %v2250_v48  ;;  %611 = vperm.xlu1 %1478, %v2250_v48  }
 0x155   :  { %990 = vst.msk [vmem:[#allocation2 + $0x48] sm:$0xff] %vm371_vm3, %v2250_v48  ;;  %571 = vperm.xlu2 %1479, %v2258_v53   ;;  %v2308_v48 = vld [vmem:[#allocation2 + $0x50] sm:$0xff] }
 0x156   :  { %3041 = vst [vmem:[#allocation11_spill] sm:$0xff] %v2258_v53 }
 0x157   :  { %886 = vst.msk [vmem:[#allocation4 + $0x8] sm:$0xff] %vm371_vm3, %v870_v51 }
 0x158   :  { %982 = vst.msk [vmem:[#allocation2 + $0x8] sm:$0xff] %vm371_vm3, %v2258_v53 }
 0x159   :  { %v473_v7 = vpop.xlane.xlu0 %472  ;;  %v495_v23 = vpop.xlane.xlu1 %494  ;;  %3048 = vst [vmem:[#allocation18_spill] sm:$0xff] %v2308_v48 }
 0x15a   :  { %v2273_v29 = vmax.f32 %v2266_v20, %v473_v7  ;;  %v2276_v51 = vmax.f32 %v2268_v61, %v495_v23  ;;  %v479_v63 = vpop.xlane.xlu2 %478  ;;  %v2295_v23 = vld [vmem:[#allocation2 + $0x30] sm:$0xff] }
 0x15b   :  { %v2283_v55 = vmax.f32 %v2270_v40, %v479_v63  ;;  %3046 = vst [vmem:[#allocation16_spill] sm:$0xff] %v2295_v23  ;;  %v814_v63 = vld [vmem:[#allocation4 + $0x48] sm:$0xff] }
 0x15c   :  { %3044 = vst [vmem:[#allocation14_spill] sm:$0xff] %v2273_v29  ;;  %631 = vperm.xlu0 %1477, %v2276_v51  }
 0x15d   :  { %3045 = vst [vmem:[#allocation15_spill] sm:$0xff] %v2276_v51  ;;  %591 = vperm.xlu2 %1479, %v2283_v55  }
 0x15e   :  { %983 = vst.msk [vmem:[#allocation2 + $0x10] sm:$0xff] %vm371_vm3, %v2273_v29 }
 0x15f   :  { %994 = vst.msk [vmem:[#allocation2 + $0x68] sm:$0xff] %vm371_vm3, %v2276_v51 }
 0x160   :  { %986 = vst.msk [vmem:[#allocation2 + $0x28] sm:$0xff] %vm371_vm3, %v2283_v55 }
 0x161   :  { %v481_v16 = vpop.xlane.xlu0 %480  ;;  %v856_v50 = vpop.xlane.xlu1 %855 }
 0x162   :  { %v2298_v5 = vmax.f32 %v2295_v23, %v481_v16  ;;  %v878_v20 = vadd.f32 %v856_v50, %v814_v63  ;;  %v850_v61 = vpop.xlane.xlu2 %849  ;;  %v807_v16 = vld [vmem:[#allocation4 + $0x10] sm:$0xff] }
 0x163   :  { %v875_v7 = vadd.f32 %v850_v61, %v811_v14  ;;  %v2310_v63 = vld [vmem:[#allocation2 + $0x70] sm:$0xff] }
 0x164   :  { %3047 = vst [vmem:[#allocation17_spill] sm:$0xff] %v2298_v5  ;;  %596 = vperm.xlu1 %1478, %v2298_v5   ;;  %576 = vperm.xlu0 %1477, %v2273_v29  }
 0x165   :  { %987 = vst.msk [vmem:[#allocation2 + $0x30] sm:$0xff] %vm371_vm3, %v2298_v5 }
 0x166   :  { %894 = vst.msk [vmem:[#allocation4 + $0x48] sm:$0xff] %vm371_vm3, %v878_v20 }
 0x167   :  { %891 = vst.msk [vmem:[#allocation4 + $0x30] sm:$0xff] %vm371_vm3, %v875_v7 }
 0x168   :  { %3049 = vst [vmem:[#allocation19_spill] sm:$0xff] %v2310_v63 }
 0x169   :  { %v842_v50 = vpop.xlane.xlu0 %841  ;;  %v489_v51 = vpop.xlane.xlu1 %488 }
 0x16a   :  { %v871_v13 = vadd.f32 %v842_v50, %v807_v16  ;;  %v2313_v23 = vmax.f32 %v2308_v48, %v489_v51  ;;  %v497_v14 = vpop.xlane.xlu2 %496  ;;  %v2331_v51 = vld [vmem:[#allocation2 + $0x38] sm:$0xff] }
 0x16b   :  { %v2317_v20 = vmax.f32 %v2310_v63, %v497_v14  ;;  %3053 = vst [vmem:[#allocation23_spill] sm:$0xff] %v2331_v51  ;;  %v2333_v16 = vld [vmem:[#allocation2 + $0x18] sm:$0xff] }
 0x16c   :  { %3050 = vst [vmem:[#allocation20_spill] sm:$0xff] %v2313_v23  ;;  %616 = vperm.xlu0 %1477, %v2313_v23   ;;  %v2361_v48 = vld [vmem:[#allocation2 + $0x58] sm:$0xff] }
 0x16d   :  { %887 = vst.msk [vmem:[#allocation4 + $0x10] sm:$0xff] %vm371_vm3, %v871_v13  ;;  %636 = vperm.xlu2 %1479, %v2317_v20   ;;  %v2329_v13 = vld [vmem:[#allocation2 + $0x78] sm:$0xff] }
 0x16e   :  { %3051 = vst [vmem:[#allocation21_spill] sm:$0xff] %v2317_v20 }
 0x16f   :  { %991 = vst.msk [vmem:[#allocation2 + $0x50] sm:$0xff] %vm371_vm3, %v2313_v23 }
 0x170   :  { %995 = vst.msk [vmem:[#allocation2 + $0x70] sm:$0xff] %vm371_vm3, %v2317_v20 }
 0x171   :  { %3052 = vst [vmem:[#allocation22_spill] sm:$0xff] %v2329_v13  ;;  %v499_v50 = vpop.xlane.xlu0 %498  ;;  %v483_v14 = vpop.xlane.xlu1 %482 }
 0x172   :  { %3054 = vst [vmem:[#allocation24_spill] sm:$0xff] %v2333_v16  ;;  %v2336_v61 = vmax.f32 %v2329_v13, %v499_v50  ;;  %v2339_v23 = vmax.f32 %v2331_v51, %v483_v14  ;;  %v475_v7 = vpop.xlane.xlu2 %474  ;;  %v808_v14 = vld [vmem:[#allocation4 + $0x18] sm:$0xff] }
 0x173   :  { %v2342_v63 = vmax.f32 %v2333_v16, %v475_v7  ;;  %v812_v7 = vld [vmem:[#allocation4 + $0x38] sm:$0xff]  ;;  %3058 = vst [vmem:[#allocation28_spill] sm:$0xff] %v2361_v48 }
 0x174   :  { %3055 = vst [vmem:[#allocation25_spill] sm:$0xff] %v2336_v61  ;;  %601 = vperm.xlu0 %1477, %v2339_v23  }
 0x175   :  { %3056 = vst [vmem:[#allocation26_spill] sm:$0xff] %v2339_v23  ;;  %581 = vperm.xlu1 %1478, %v2342_v63  }
 0x176   :  { %3057 = vst [vmem:[#allocation27_spill] sm:$0xff] %v2342_v63 }
 0x177   :  { %996 = vst.msk [vmem:[#allocation2 + $0x78] sm:$0xff] %vm371_vm3, %v2336_v61 }
 0x178   :  { %988 = vst.msk [vmem:[#allocation2 + $0x38] sm:$0xff] %vm371_vm3, %v2339_v23 }
 0x179   :  { %984 = vst.msk [vmem:[#allocation2 + $0x18] sm:$0xff] %vm371_vm3, %v2342_v63  ;;  %v852_v20 = vpop.xlane.xlu1 %851 }
 0x17a   :  { %v876_v13 = vadd.f32 %v852_v20, %v812_v7  ;;  %v844_v29 = vpop.xlane.xlu2 %843 }
 0x17b   :  { %v872_v5 = vadd.f32 %v844_v29, %v808_v14 }
 0x17c   :  { %892 = vst.msk [vmem:[#allocation4 + $0x38] sm:$0xff] %vm371_vm3, %v876_v13 }
 0x17d   :  { %888 = vst.msk [vmem:[#allocation4 + $0x18] sm:$0xff] %vm371_vm3, %v872_v5  ;;  %641 = vperm.xlu1 %1478, %v2336_v61  }
 0x182   :  { %v491_v50 = vpop.xlane.xlu2 %490 }
 0x183   :  { %v2364_v16 = vmax.f32 %v2361_v48, %v491_v50 }
 0x185   :  { %3059 = vst [vmem:[#allocation29_spill] sm:$0xff] %v2364_v16  ;;  %621 = vperm.xlu2 %1479, %v2364_v16  }
 0x186   :  { %992 = vst.msk [vmem:[#allocation2 + $0x58] sm:$0xff] %vm371_vm3, %v2364_v16 }
 0x19f   :  { %v607_v29 = vpop.permute.xlu2 %606 }
 0x1a0   :  { %v652_v20 = vsub.f32 %v1984_v4, %v607_v29 }
 0x1a2   :  { %v676_v5 = vmul.f32 1.442695, %v652_v20 }
 0x1a4   :  { %1481 = vpow2.f32 %v676_v5 }
 0x1aa   :  { %v1482_v13 = vpop.eup %1481 }
 0x1ab   :  { %v700_v7 = vmul.f32 %v1482_v13, %v1848_v42 }
 0x1ad   :  { %756 = vadd.xlane.f32.xlu1 %v700_v7 }
 0x1ae   :  { %v567_v14 = vpop.permute.xlu1 %566 }
 0x1af   :  { %v644_v50 = vsub.f32 %v1970_v9, %v567_v14  ;;  %v572_v61 = vpop.permute.xlu2 %571 }
 0x1b0   :  { %v645_v42 = vsub.f32 %v2027_v31, %v572_v61 }
 0x1b1   :  { %v660_v23 = vmul.f32 1.442695, %v644_v50 }
 0x1b3   :  { %1483 = vpow2.f32 %v660_v23  ;;  %v662_v23 = vmul.f32 1.442695, %v645_v42 }
 0x1b6   :  { %v627_v63 = vpop.permute.xlu1 %626  ;;  %v587_v48 = vpop.permute.xlu0 %586 }
 0x1b7   :  { %v656_v51 = vsub.f32 %v1980_v19, %v627_v63  ;;  %v648_v16 = vsub.f32 %v1976_v2, %v587_v48  ;;  %v592_v53 = vpop.permute.xlu2 %591 }
 0x1b8   :  { %v649_v4 = vsub.f32 %v2071_v43, %v592_v53 }
 0x1b9   :  { %v1484_v29 = vpop.eup %1483  ;;  %v684_v20 = vmul.f32 1.442695, %v656_v51  ;;  %v668_v5 = vmul.f32 1.442695, %v648_v16 }
 0x1ba   :  { %v670_v13 = vmul.f32 1.442695, %v649_v4  ;;  %v692_v9 = vmul.f32 %v1484_v29, %v1785_v12 }
 0x1bb   :  { %1485 = vpow2.f32 %v684_v20 }
 0x1bc   :  { %1487 = vpow2.f32 %v668_v5  ;;  %740 = vadd.xlane.f32.xlu0 %v692_v9 }
 0x1bd   :  { %1489 = vpow2.f32 %v670_v13 }
 0x1be   :  { %1491 = vpow2.f32 %v662_v23 }
 0x1c1   :  { %v1486_v7 = vpop.eup %1485 }
 0x1c2   :  { %v1488_v19 = vpop.eup %1487  ;;  %v704_v2 = vmul.f32 %v1486_v7, %v1936_v33 }
 0x1c3   :  { %v1490_v48 = vpop.eup %1489  ;;  %v696_v43 = vmul.f32 %v1488_v19, %v1837_v37 }
 0x1c4   :  { %764 = vadd.xlane.f32.xlu0 %v704_v2  ;;  %v697_v53 = vmul.f32 %v1490_v48, %v1804_v24  ;;  %v1492_v63 = vpop.eup %1491 }
 0x1c5   :  { %748 = vadd.xlane.f32.xlu2 %v696_v43  ;;  %v693_v51 = vmul.f32 %v1492_v63, %v1825_v32 }
 0x1c6   :  { %v612_v31 = vpop.permute.xlu1 %611  ;;  %750 = vadd.xlane.f32.xlu1 %v697_v53 }
 0x1c7   :  { %v653_v12 = vsub.f32 %v2018_v57, %v612_v31  ;;  %v637_v4 = vpop.permute.xlu2 %636 }
 0x1c8   :  { %v658_v32 = vsub.f32 %v2118_v56, %v637_v4 }
 0x1c9   :  { %v678_v61 = vmul.f32 1.442695, %v653_v12 }
 0x1cb   :  { %1493 = vpow2.f32 %v678_v61 }
 0x1cd   :  { %742 = vadd.xlane.f32.xlu2 %v693_v51 }
 0x1ce   :  { %v632_v16 = vpop.permute.xlu0 %631 }
 0x1cf   :  { %v657_v33 = vsub.f32 %v2056_v39, %v632_v16 }
 0x1d1   :  { %v1494_v14 = vpop.eup %1493  ;;  %v686_v50 = vmul.f32 1.442695, %v657_v33 }
 0x1d2   :  { %v701_v37 = vmul.f32 %v1494_v14, %v1902_v11  ;;  %v688_v11 = vmul.f32 1.442695, %v658_v32 }
 0x1d3   :  { %1495 = vpow2.f32 %v686_v50 }
 0x1d4   :  { %758 = vadd.xlane.f32.xlu0 %v701_v37 }
 0x1d6   :  { %v597_v24 = vpop.permute.xlu1 %596  ;;  %v577_v29 = vpop.permute.xlu0 %576 }
 0x1d7   :  { %v650_v57 = vsub.f32 %v2084_v45, %v597_v24  ;;  %v646_v20 = vsub.f32 %v2050_v36, %v577_v29  ;;  %v2416_v29 = vld [vmem:[#allocation5] sm:$0xff] }
 0x1d8   :  { %vm1117_vm7 = vweird.f32 %v2416_v29 }
 0x1d9   :  { %v672_v5 = vmul.f32 1.442695, %v650_v57  ;;  %v1496_v42 = vpop.eup %1495  ;;  %v664_v13 = vmul.f32 1.442695, %v646_v20 }
 0x1da   :  { %v705_v39 = vmul.f32 %v1496_v42, %v1952_v3 }
 0x1db   :  { %1497 = vpow2.f32 %v672_v5  ;;  %v3063_v5 = vsub.f32 %v2214_v22, %v2222_v47  ;;  %v2437_v47 = vld [vmem:[#allocation5 + $0x28] sm:$0xff] }
 0x1dc   :  { %1499 = vpow2.f32 %v664_v13  ;;  %766 = vadd.xlane.f32.xlu2 %v705_v39  ;;  %v3064_v13 = vsub.f32 %v2270_v40, %v2283_v55  ;;  %vm1192_vm11 = vweird.f32 %v2437_v47 }
 0x1dd   :  { %1501 = vpow2.f32 %v688_v11  ;;  %v708_v11 = vld [vmem:[#allocation3] sm:$0xff] }
 0x1de   :  { %v617_v9 = vpop.permute.xlu0 %616  ;;  %v542_v39 = vmul.f32 1.442695, %v3064_v13 }
 0x1df   :  { %v654_v23 = vsub.f32 %v2112_v54, %v617_v9  ;;  %v622_v7 = vpop.permute.xlu2 %621 }
 0x1e0   :  { %v655_v36 = vsub.f32 %v2174_v46, %v622_v7 }
 0x1e1   :  { %v1498_v19 = vpop.eup %1497  ;;  %v680_v2 = vmul.f32 1.442695, %v654_v23 }
 0x1e2   :  { %v1500_v45 = vpop.eup %1499  ;;  %v698_v48 = vmul.f32 %v1498_v19, %v1867_v52  ;;  %v682_v3 = vmul.f32 1.442695, %v655_v36 }
 0x1e3   :  { %v694_v56 = vmul.f32 %v1500_v45, %v1782_v10  ;;  %1503 = vpow2.f32 %v680_v2  ;;  %v1502_v53 = vpop.eup %1501  ;;  %v2441_v45 = vld [vmem:[#allocation5 + $0x10] sm:$0xff] }
 0x1e4   :  { %752 = vadd.xlane.f32.xlu0 %v698_v48  ;;  %1505 = vpow2.f32 %v682_v3  ;;  %v706_v52 = vmul.f32 %v1502_v53, %v1919_v21  ;;  %v2447_v3 = vld [vmem:[#allocation5 + $0x8] sm:$0xff] }
 0x1e5   :  { %744 = vadd.xlane.f32.xlu1 %v694_v56  ;;  %v1088_v56 = vld [vmem:[#allocation4 + $0x40] sm:$0xff]  ;;  %vm1132_vm15 = vweird.f32 %v2447_v3 }
 0x1e6   :  { %v602_v43 = vpop.permute.xlu0 %601 }
 0x1e7   :  { %v651_v31 = vsub.f32 %v2141_v27, %v602_v43  ;;  %v582_v54 = vpop.permute.xlu1 %581  ;;  %v3067_v43 = vld [vmem:[#allocation11_spill] sm:$0xff] }
 0x1e8   :  { %v647_v12 = vsub.f32 %v2147_v15, %v582_v54  ;;  %v3068_v53 = vsub.f32 %v2247_v38, %v3067_v43  ;;  %v1153_v43 = vand.u32 2147483648, %v2441_v45 }
 0x1e9   :  { %v1504_v63 = vpop.eup %1503  ;;  %v674_v61 = vmul.f32 1.442695, %v651_v31 }
 0x1ea   :  { %v666_v51 = vmul.f32 1.442695, %v647_v12  ;;  %v702_v46 = vmul.f32 %v1504_v63, %v1927_v25  ;;  %v1506_v10 = vpop.eup %1505  ;;  %v832_v25 = vmul.f32 %v1912_v18, %v2169_v0  ;;  %v534_v31 = vmul.f32 1.442695, %v3068_v53  ;;  %v1080_v53 = vld [vmem:[#allocation4] sm:$0xff] }
 0x1eb   :  { %1507 = vpow2.f32 %v674_v61  ;;  %v703_v37 = vmul.f32 %v1506_v10, %v1886_v60  ;;  %v1104_v60 = vld [vmem:[#allocation5 + $0x40] sm:$0xff] }
 0x1ec   :  { %1509 = vpow2.f32 %v666_v51  ;;  %760 = vadd.xlane.f32.xlu2 %v702_v46  ;;  %vm1237_vm2 = vweird.f32 %v1104_v60  ;;  %v1243_v32 = vand.u32 2147483648, %v1104_v60  ;;  %v1008_v61 = vld [vmem:[#allocation2 + $0x40] sm:$0xff] }
 0x1ed   :  { %768 = vadd.xlane.f32.xlu1 %v706_v52  ;;  %v720_v46 = vld [vmem:[#allocation3 + $0x60] sm:$0xff] }
 0x1ee   :  { %v1244_v40 = vor.u32 1.1754944e-38, %v1243_v32 }
 0x1ef   :  { %v642_v16 = vpop.permute.xlu1 %641 }
 0x1f0   :  { %v659_v33 = vsub.f32 %v2135_v62, %v642_v16 }
 0x1f1   :  { %v1508_v27 = vpop.eup %1507 }
 0x1f2   :  { %v1510_v14 = vpop.eup %1509  ;;  %v690_v50 = vmul.f32 1.442695, %v659_v33  ;;  %v699_v15 = vmul.f32 %v1508_v27, %v1880_v58  ;;  %v712_v33 = vld [vmem:[#allocation3 + $0x20] sm:$0xff] }
 0x1f3   :  { %v695_v24 = vmul.f32 %v1510_v14, %v1822_v30  ;;  %v3060_v30 = vsub.f32 %v2216_v59, %v2229_v44  ;;  %v3062_v44 = vsub.f32 %v2212_v26, %v2219_v28  ;;  %v1241_v26 = vand.u32 2147483647, %v1104_v60  ;;  %v2431_v28 = vld [vmem:[#allocation5 + $0x20] sm:$0xff]  ;;  %v713_v14 = vld [vmem:[#allocation3 + $0x28] sm:$0xff] }
 0x1f4   :  { %1511 = vpow2.f32 %v690_v50  ;;  %754 = vadd.xlane.f32.xlu2 %v699_v15  ;;  %vm1177_vm12 = vweird.f32 %v2431_v28 }
 0x1f5   :  { %762 = vadd.xlane.f32.xlu1 %v703_v37  ;;  %746 = vadd.xlane.f32.xlu0 %v695_v24  ;;  %v548_v58 = vmul.f32 1.442695, %v3060_v30  ;;  %v556_v20 = vmul.f32 1.442695, %v3062_v44  ;;  %vm1242_vm6 = vcmp.eq.f32.partialorder %v1241_v26, 8.507059e+37  ;;  %v3070_v30 = vld [vmem:[#allocation10_spill] sm:$0xff] }
 0x1f7   :  { %1513 = vpow2.f32 %v548_v58 }
 0x1f8   :  { %1515 = vrcp.f32 %v1104_v60 }
 0x1fa   :  { %v1512_v21 = vpop.eup %1511 }
 0x1fb   :  { %v707_v4 = vmul.f32 %v1512_v21, %v1957_v49  ;;  %v716_v49 = vld [vmem:[#allocation3 + $0x40] sm:$0xff] }
 0x1fc   :  { %859 = vadd.xlane.f32.xlu2 %v832_v25 }
 0x1fd   :  { %861 = vadd.xlane.f32.xlu1 %v1986_v6  ;;  %770 = vadd.xlane.f32.xlu0 %v707_v4  ;;  %v1514_v18 = vpop.eup %1513  ;;  %v3069_v4 = vld [vmem:[#allocation9_spill] sm:$0xff] }
 0x1fe   :  { %v1516_v62 = vpop.eup %1515  ;;  %v732_v6 = vmul.f32 %v1514_v18, %v716_v49  ;;  %v3071_v58 = vsub.f32 %v3069_v4, %v3070_v30  ;;  %v2528_v4 = vld [vmem:[#allocation5 + $0x30] sm:$0xff] }
 0x1ff   :  { %v1233_v0 = vmul.f32 %v1516_v62, %v1104_v60  ;;  %vm1238_vm4 = vweird.f32 %v1516_v62 }
 0x200   :  { %vm2433_vm5 = vmor %vm1237_vm2, %vm1238_vm4  ;;  %v550_v60 = vmul.f32 1.442695, %v3071_v58 }
 0x204   :  { %865 = vadd.xlane.f32.xlu2 %v2032_v34  ;;  %v3061_v34 = vsub.f32 %v2201_v8, %v2204_v1  ;;  %v540_v8 = vmul.f32 1.442695, %v3063_v5  ;;  %v2478_v5 = vld [vmem:[#allocation5 + $0x48] sm:$0xff] }
 0x205   :  { %867 = vadd.xlane.f32.xlu1 %v2061_v41  ;;  %857 = vadd.xlane.f32.xlu0 %v2034_v35 }
 0x206   :  { %v532_v41 = vmul.f32 1.442695, %v3061_v34 }
 0x208   :  { %1517 = vpow2.f32 %v532_v41 }
 0x209   :  { %1519 = vrcp.f32 %v2416_v29 }
 0x20d   :  { %863 = vadd.xlane.f32.xlu0 %v2003_v17  ;;  %v1234_v17 = vsub.f32 1.0, %v1233_v0 }
 0x20e   :  { %v1518_v42 = vpop.eup %1517 }
 0x20f   :  { %v1235_v59 = vmul.f32 %v1516_v62, %v1234_v17  ;;  %v2429_v9 = vpop.eup %1519  ;;  %v724_v7 = vmul.f32 %v1518_v42, %v708_v11  ;;  %v1123_v17 = vand.u32 2147483648, %v2416_v29 }
 0x210   :  { %v1113_v55 = vmul.f32 %v2429_v9, %v2416_v29  ;;  %vm1118_vm8 = vweird.f32 %v2429_v9 }
 0x211   :  { %v1236_v23 = vadd.f32 %v1516_v62, %v1235_v59  ;;  %vm2491_vm9 = vmor %vm1117_vm7, %vm1118_vm8  ;;  %v1124_v22 = vor.u32 1.1754944e-38, %v1123_v17 }
 0x212   :  { %v1114_v63 = vsub.f32 1.0, %v1113_v55  ;;  %v3076_v55 = vld [vmem:[#allocation13_spill] sm:$0xff] }
 0x213   :  { %v1240_v2 = vsel %vm2433_vm5, %v1516_v62, %v1236_v23 }
 0x214   :  { %v1245_v51 = vsel %vm1242_vm6, %v1244_v40, %v1240_v2  ;;  %v1115_v24 = vmul.f32 %v2429_v9, %v1114_v63  ;;  %v3077_v40 = vld [vmem:[#allocation15_spill] sm:$0xff] }
 0x215   :  { %v1246_v10 = vmul.f32 %v1245_v51, %v1088_v56 }
 0x220   :  { %v757_v57 = vpop.xlane.xlu1 %756 }
 0x221   :  { %v780_v35 = vadd.f32 %v757_v57, %v732_v6 }
 0x223   :  { %797 = vst.msk [vmem:[#allocation3 + $0x40] sm:$0xff] %vm371_vm3, %v780_v35 }
 0x22a   :  { %v1024_v1 = vld [vmem:[#allocation3 + $0x40] sm:$0xff] }
 0x22b   :  { %1521 = vlog2.f32 %v1024_v1  ;;  %v1121_v1 = vand.u32 2147483647, %v2416_v29 }
 0x22c   :  { %1523 = vpow2.f32 %v556_v20 }
 0x22d   :  { %1525 = vpow2.f32 %v540_v8  ;;  %v1116_v8 = vadd.f32 %v2429_v9, %v1115_v24  ;;  %vm2503_vm10 = vcmp.eq.f32.partialorder %v1121_v1, 8.507059e+37  ;;  %v1183_v24 = vand.u32 2147483648, %v2431_v28 }
 0x22e   :  { %1527 = vpow2.f32 %v542_v39  ;;  %v709_v39 = vld [vmem:[#allocation3 + $0x8] sm:$0xff] }
 0x22f   :  { %v741_v19 = vpop.xlane.xlu0 %740  ;;  %1529 = vrcp.f32 %v2431_v28  ;;  %v1120_v29 = vsel %vm2491_vm9, %v2429_v9, %v1116_v8  ;;  %v1198_v9 = vand.u32 2147483648, %v2437_v47  ;;  %v3084_v8 = vld [vmem:[#allocation17_spill] sm:$0xff]  ;;  %vm1252_vm9 = vweird.f32 %v2478_v5 }
 0x230   :  { %v772_v36 = vadd.f32 %v741_v19, %v724_v7  ;;  %1531 = vrcp.f32 %v2437_v47  ;;  %v3078_v19 = vsub.f32 %v3076_v55, %v3077_v40  ;;  %v1138_v7 = vand.u32 2147483648, %v2447_v3 }
 0x231   :  { %v1522_v48 = vpop.eup %1521  ;;  %1533 = vrcp.f32 %v2441_v45  ;;  %v1199_v17 = vor.u32 1.1754944e-38, %v1198_v9 }
 0x232   :  { %v1049_v54 = vmul.f32 0.6931472, %v1522_v48  ;;  %789 = vst.msk [vmem:[#allocation3] sm:$0xff] %vm371_vm3, %v772_v36  ;;  %v1524_v12 = vpop.eup %1523  ;;  %1535 = vrcp.f32 %v2447_v3  ;;  %v558_v2 = vmul.f32 1.442695, %v3078_v19  ;;  %v1084_v19 = vld [vmem:[#allocation4 + $0x20] sm:$0xff] }
 0x233   :  { %v1526_v52 = vpop.eup %1525  ;;  %1537 = vpow2.f32 %v534_v31  ;;  %v736_v15 = vmul.f32 %v1524_v12, %v720_v46 }
 0x234   :  { %v1072_v16 = vadd.f32 %v1049_v54, %v1008_v61  ;;  %v1528_v27 = vpop.eup %1527  ;;  %v728_v25 = vmul.f32 %v1526_v52, %v712_v33  ;;  %v1000_v52 = vld [vmem:[#allocation2] sm:$0xff]  ;;  %v2519_v33 = vld [vmem:[#allocation5 + $0x18] sm:$0xff] }
 0x235   :  { %v2455_v38 = vpop.eup %1529  ;;  %v729_v6 = vmul.f32 %v1528_v27, %v713_v14 }
 0x236   :  { %v1360_v50 = vsub.f32 %v1246_v10, %v1072_v16  ;;  %v2457_v37 = vpop.eup %1531  ;;  %v1173_v57 = vmul.f32 %v2455_v38, %v2431_v28  ;;  %v1125_v10 = vsel %vm2503_vm10, %v1124_v22, %v1120_v29  ;;  %v717_v16 = vld [vmem:[#allocation3 + $0x48] sm:$0xff]  ;;  %vm1178_vm13 = vweird.f32 %v2455_v38 }
 0x237   :  { %v765_v21 = vpop.xlane.xlu0 %764  ;;  %v2463_v0 = vpop.eup %1533  ;;  %v1188_v59 = vmul.f32 %v2457_v37, %v2437_v47  ;;  %v1126_v27 = vmul.f32 %v1125_v10, %v1080_v53  ;;  %vm1193_vm14 = vweird.f32 %v2457_v37  ;;  %vm2539_vm0 = vmor %vm1177_vm12, %vm1178_vm13  ;;  %vm1207_vm13 = vweird.f32 %v2528_v4 }
 0x238   :  { %v1376_v18 = vmul.f32 -1.0, %v1360_v50  ;;  %v784_v49 = vadd.f32 %v765_v21, %v736_v15  ;;  %v749_v62 = vpop.xlane.xlu2 %748  ;;  %v2476_v20 = vpop.eup %1535  ;;  %v2485_v32 = vmul.f32 %v2463_v0, %v2441_v45  ;;  %v1174_v11 = vsub.f32 1.0, %v1173_v57  ;;  %vm2550_vm1 = vmor %vm1192_vm11, %vm1193_vm14 }
 0x239   :  { %v1016_v34 = vld [vmem:[#allocation3] sm:$0xff]  ;;  %v776_v41 = vadd.f32 %v749_v62, %v728_v25  ;;  %v751_v35 = vpop.xlane.xlu1 %750  ;;  %v1538_v42 = vpop.eup %1537  ;;  %v1189_v23 = vsub.f32 1.0, %v1188_v59  ;;  %v1128_v26 = vmul.f32 %v2476_v20, %v2447_v3  ;;  %v1181_v21 = vand.u32 2147483647, %v2431_v28  ;;  %v2610_v62 = vld [vmem:[#allocation5 + $0x70] sm:$0xff] }
 0x23a   :  { %1392 = vst.msk [vmem:[%s3017_s4 + $0x40] sm:$0xff] %vm371_vm3, %v1376_v18  ;;  %1539 = vlog2.f32 %v1016_v34  ;;  %v777_v44 = vadd.f32 %v751_v35, %v729_v6  ;;  %v725_v36 = vmul.f32 %v1538_v42, %v709_v39  ;;  %v1144_v56 = vsub.f32 1.0, %v2485_v32 }
 0x23b   :  { %801 = vst.msk [vmem:[#allocation3 + $0x60] sm:$0xff] %vm371_vm3, %v784_v49  ;;  %1541 = vpow2.f32 %v550_v60  ;;  %v1175_v54 = vmul.f32 %v2455_v38, %v1174_v11  ;;  %v1190_v51 = vmul.f32 %v2457_v37, %v1189_v23  ;;  %v1129_v46 = vsub.f32 1.0, %v1128_v26  ;;  %v3088_v11 = vld [vmem:[#allocation12_spill] sm:$0xff]  ;;  %v3089_v23 = vld [vmem:[#allocation14_spill] sm:$0xff] }
 0x23c   :  { %793 = vst.msk [vmem:[#allocation3 + $0x20] sm:$0xff] %vm371_vm3, %v776_v41  ;;  %1543 = vrcp.f32 %v2478_v5  ;;  %v1196_v49 = vand.u32 2147483647, %v2437_v47  ;;  %v1184_v59 = vor.u32 1.1754944e-38, %v1183_v24  ;;  %vm2561_vm2 = vcmp.eq.f32.partialorder %v1181_v21, 8.507059e+37  ;;  %v2604_v24 = vld [vmem:[#allocation5 + $0x38] sm:$0xff] }
 0x23d   :  { %794 = vst.msk [vmem:[#allocation3 + $0x28] sm:$0xff] %vm371_vm3, %v777_v44  ;;  %1545 = vpow2.f32 %v558_v2  ;;  %v1176_v30 = vadd.f32 %v2455_v38, %v1175_v54  ;;  %v1191_v18 = vadd.f32 %v2457_v37, %v1190_v51  ;;  %v1130_v57 = vmul.f32 %v2476_v20, %v1129_v46  ;;  %v3083_v44 = vld [vmem:[#allocation16_spill] sm:$0xff] }
 0x23e   :  { %v3085_v1 = vsub.f32 %v3083_v44, %v3084_v8  ;;  %vm1133_vm4 = vweird.f32 %v2476_v20  ;;  %v3090_v26 = vsub.f32 %v3088_v11, %v3089_v23  ;;  %vm2578_vm5 = vcmp.eq.f32.partialorder %v1196_v49, 8.507059e+37  ;;  %v3100_v8 = vld [vmem:[#allocation19_spill] sm:$0xff] }
 0x23f   :  { %v1180_v39 = vsel %vm2539_vm0, %v2455_v38, %v1176_v30  ;;  %v1168_v38 = vand.u32 2147483648, %v2519_v33  ;;  %v1195_v55 = vsel %vm2550_vm1, %v2457_v37, %v1191_v18  ;;  %v1131_v9 = vadd.f32 %v2476_v20, %v1130_v57  ;;  %v1004_v37 = vld [vmem:[#allocation2 + $0x20] sm:$0xff]  ;;  %vm2594_vm6 = vmor %vm1132_vm15, %vm1133_vm4  ;;  %v3097_v57 = vld [vmem:[#allocation18_spill] sm:$0xff] }
 0x240   :  { %v1540_v48 = vpop.eup %1539  ;;  %v743_v31 = vpop.xlane.xlu2 %742  ;;  %v544_v42 = vmul.f32 1.442695, %v3085_v1  ;;  %v536_v22 = vmul.f32 1.442695, %v3090_v26  ;;  %v1136_v46 = vand.u32 2147483647, %v2447_v3  ;;  %v1200_v10 = vsel %vm2578_vm5, %v1199_v17, %v1195_v55 }
 0x241   :  { %v1033_v12 = vmul.f32 0.6931472, %v1540_v48  ;;  %v773_v63 = vadd.f32 %v743_v31, %v725_v36  ;;  %v1542_v61 = vpop.eup %1541  ;;  %v2583_v48 = vld [vmem:[#allocation5 + $0x58] sm:$0xff]  ;;  %v1085_v31 = vld [vmem:[#allocation4 + $0x28] sm:$0xff]  ;;  %v3101_v1 = vld [vmem:[#allocation21_spill] sm:$0xff]  ;;  %vm1147_vm11 = vweird.f32 %v2441_v45  ;;  %vm1148_vm14 = vweird.f32 %v2463_v0 }
 0x242   :  { %v2523_v15 = vpop.eup %1543  ;;  %v733_v60 = vmul.f32 %v1542_v61, %v717_v16  ;;  %v1185_v61 = vsel %vm2561_vm2, %v1184_v59, %v1180_v39  ;;  %v1201_v21 = vmul.f32 %v1200_v10, %v1085_v31  ;;  %vm2612_vm7 = vcmp.eq.f32.partialorder %v1136_v46, 8.507059e+37  ;;  %v2633_v55 = vld [vmem:[#allocation5 + $0x50] sm:$0xff]  ;;  %vm2753_vm2 = vmor %vm1147_vm11, %vm1148_vm14 }
 0x243   :  { %v1064_v14 = vadd.f32 %v1033_v12, %v1000_v52  ;;  %v1020_v50 = vld [vmem:[#allocation3 + $0x20] sm:$0xff]  ;;  %790 = vst.msk [vmem:[#allocation3 + $0x8] sm:$0xff] %vm371_vm3, %v773_v63  ;;  %v1248_v34 = vmul.f32 %v2523_v15, %v2478_v5  ;;  %v1546_v13 = vpop.eup %1545  ;;  %v721_v12 = vld [vmem:[#allocation3 + $0x68] sm:$0xff]  ;;  %v1186_v16 = vmul.f32 %v1185_v61, %v1084_v19  ;;  %vm1253_vm8 = vweird.f32 %v2523_v15 }
 0x244   :  { %1547 = vlog2.f32 %v1020_v50  ;;  %v1021_v25 = vld [vmem:[#allocation3 + $0x28] sm:$0xff]  ;;  %v737_v30 = vmul.f32 %v1546_v13, %v721_v12  ;;  %v1258_v31 = vand.u32 2147483648, %v2478_v5  ;;  %vm2658_vm10 = vmor %vm1252_vm9, %vm1253_vm8  ;;  %vm1222_vm15 = vweird.f32 %v2604_v24 }
 0x245   :  { %v1352_v58 = vsub.f32 %v1126_v27, %v1064_v14  ;;  %1549 = vlog2.f32 %v1021_v25  ;;  %v1249_v53 = vsub.f32 1.0, %v1248_v34  ;;  %v1005_v27 = vld [vmem:[#allocation2 + $0x28] sm:$0xff]  ;;  %v3098_v34 = vld [vmem:[#allocation20_spill] sm:$0xff]  ;;  %vm1162_vm1 = vweird.f32 %v2519_v33 }
 0x246   :  { %1551 = vrcp.f32 %v2519_v33  ;;  %v3099_v41 = vsub.f32 %v3097_v57, %v3098_v34  ;;  %v1001_v19 = vld [vmem:[#allocation2 + $0x8] sm:$0xff] }
 0x247   :  { %v759_v6 = vpop.xlane.xlu0 %758  ;;  %v1368_v35 = vmul.f32 -1.0, %v1352_v58  ;;  %1553 = vrcp.f32 %v2528_v4  ;;  %v1250_v3 = vmul.f32 %v2523_v15, %v1249_v53  ;;  %v1135_v58 = vsel %vm2594_vm6, %v2476_v20, %v1131_v9  ;;  %v1081_v20 = vld [vmem:[#allocation4 + $0x8] sm:$0xff]  ;;  %v2646_v9 = vld [vmem:[#allocation5 + $0x60] sm:$0xff] }
 0x248   :  { %v781_v28 = vadd.f32 %v759_v6, %v733_v60  ;;  %v1139_v60 = vor.u32 1.1754944e-38, %v1138_v7  ;;  %vm1282_vm6 = vweird.f32 %v2583_v48  ;;  %vm1297_vm8 = vweird.f32 %v2646_v9 }
 0x249   :  { %1384 = vst.msk [vmem:[%s3017_s4] sm:$0xff] %vm371_vm3, %v1368_v35  ;;  %v552_v35 = vmul.f32 1.442695, %v3099_v41 }
 0x24a   :  { %v1548_v29 = vpop.eup %1547  ;;  %v1017_v2 = vld [vmem:[#allocation3 + $0x8] sm:$0xff]  ;;  %798 = vst.msk [vmem:[#allocation3 + $0x48] sm:$0xff] %vm371_vm3, %v781_v28  ;;  %v1140_v40 = vsel %vm2612_vm7, %v1139_v60, %v1135_v58  ;;  %v3105_v60 = vld [vmem:[#allocation23_spill] sm:$0xff] }
 0x24b   :  { %v1550_v36 = vpop.eup %1549  ;;  %v1041_v54 = vmul.f32 0.6931472, %v1548_v29  ;;  %1555 = vlog2.f32 %v1017_v2  ;;  %v714_v29 = vld [vmem:[#allocation3 + $0x30] sm:$0xff]  ;;  %v1251_v2 = vadd.f32 %v2523_v15, %v1250_v3  ;;  %v1259_v3 = vor.u32 1.1754944e-38, %v1258_v31  ;;  %v1089_v58 = vld [vmem:[#allocation4 + $0x48] sm:$0xff]  ;;  %v2705_v31 = vld [vmem:[#allocation5 + $0x78] sm:$0xff] }
 0x24c   :  { %v2586_v63 = vpop.eup %1551  ;;  %1557 = vpow2.f32 %v544_v42  ;;  %v1043_v52 = vmul.f32 0.6931472, %v1550_v36  ;;  %v3102_v42 = vsub.f32 %v3100_v8, %v3101_v1  ;;  %v710_v36 = vld [vmem:[#allocation3 + $0x10] sm:$0xff]  ;;  %v1213_v8 = vand.u32 2147483648, %v2528_v4  ;;  %v1009_v1 = vld [vmem:[#allocation2 + $0x48] sm:$0xff] }
 0x24d   :  { %1559 = vpow2.f32 %v536_v22  ;;  %v1068_v14 = vadd.f32 %v1041_v54, %v1004_v37  ;;  %v2601_v50 = vpop.eup %1553  ;;  %v2621_v44 = vmul.f32 %v2586_v63, %v2519_v33  ;;  %v1141_v54 = vmul.f32 %v1140_v40, %v1081_v20 }
 0x24e   :  { %1561 = vrcp.f32 %v2583_v48  ;;  %v1069_v25 = vadd.f32 %v1043_v52, %v1005_v27  ;;  %v560_v13 = vmul.f32 1.442695, %v3102_v42  ;;  %v2629_v23 = vmul.f32 %v2601_v50, %v2528_v4  ;;  %v3111_v42 = vld [vmem:[#allocation24_spill] sm:$0xff] }
 0x24f   :  { %v1356_v18 = vsub.f32 %v1186_v16, %v1068_v14  ;;  %v767_v49 = vpop.xlane.xlu2 %766  ;;  %1563 = vrcp.f32 %v2604_v24  ;;  %v1256_v37 = vand.u32 2147483647, %v2478_v5  ;;  %v1159_v51 = vsub.f32 1.0, %v2621_v44 }
 0x250   :  { %v1357_v28 = vsub.f32 %v1201_v21, %v1069_v25  ;;  %v785_v17 = vadd.f32 %v767_v49, %v737_v30  ;;  %v1204_v14 = vsub.f32 1.0, %v2629_v23  ;;  %v1255_v5 = vsel %vm2658_vm10, %v2523_v15, %v1251_v2  ;;  %v3108_v15 = vld [vmem:[#allocation28_spill] sm:$0xff] }
 0x251   :  { %v1556_v59 = vpop.eup %1555  ;;  %v1372_v39 = vmul.f32 -1.0, %v1356_v18  ;;  %v1025_v47 = vld [vmem:[#allocation3 + $0x48] sm:$0xff]  ;;  %vm1257_vm12 = vcmp.eq.f32.partialorder %v1256_v37, 8.507059e+37  ;;  %v1288_v2 = vand.u32 2147483648, %v2583_v48  ;;  %vm1208_vm0 = vweird.f32 %v2601_v50 }
 0x252   :  { %v1558_v11 = vpop.eup %1557  ;;  %v1373_v26 = vmul.f32 -1.0, %v1357_v28  ;;  %v1035_v22 = vmul.f32 0.6931472, %v1556_v59  ;;  %1565 = vlog2.f32 %v1025_v47  ;;  %802 = vst.msk [vmem:[#allocation3 + $0x68] sm:$0xff] %vm371_vm3, %v785_v17  ;;  %v3106_v18 = vld [vmem:[#allocation26_spill] sm:$0xff]  ;;  %v3109_v28 = vld [vmem:[#allocation29_spill] sm:$0xff]  ;;  %v1260_v32 = vsel %vm1257_vm12, %v1259_v3, %v1255_v5  ;;  %vm2769_vm4 = vmor %vm1207_vm13, %vm1208_vm0 }
 0x253   :  { %v1560_v7 = vpop.eup %1559  ;;  %1567 = vrcp.f32 %v2610_v62  ;;  %1388 = vst.msk [vmem:[%s3017_s4 + $0x20] sm:$0xff] %vm371_vm3, %v1372_v39  ;;  %v730_v61 = vmul.f32 %v1558_v11, %v714_v29  ;;  %v3107_v49 = vsub.f32 %v3105_v60, %v3106_v18  ;;  %v3110_v17 = vsub.f32 %v3108_v15, %v3109_v28  ;;  %v722_v29 = vld [vmem:[#allocation3 + $0x70] sm:$0xff]  ;;  %v3114_v15 = vld [vmem:[#allocation22_spill] sm:$0xff]  ;;  %v3115_v28 = vld [vmem:[#allocation25_spill] sm:$0xff] }
 0x254   :  { %v2643_v53 = vpop.eup %1561  ;;  %1569 = vpow2.f32 %v552_v35  ;;  %1389 = vst.msk [vmem:[%s3017_s4 + $0x28] sm:$0xff] %vm371_vm3, %v1373_v26  ;;  %v1065_v12 = vadd.f32 %v1035_v22, %v1001_v19  ;;  %v726_v16 = vmul.f32 %v1560_v7, %v710_v36  ;;  %v2677_v35 = vmul.f32 %v2463_v0, %v1144_v56  ;;  %v3112_v56 = vld [vmem:[#allocation27_spill] sm:$0xff] }
 0x255   :  { %1571 = vpow2.f32 %v560_v13  ;;  %v2662_v27 = vpop.eup %1563  ;;  %v546_v6 = vmul.f32 1.442695, %v3107_v49  ;;  %v554_v59 = vmul.f32 1.442695, %v3110_v17  ;;  %v3113_v13 = vsub.f32 %v3111_v42, %v3112_v56  ;;  %v718_v7 = vld [vmem:[#allocation3 + $0x50] sm:$0xff]  ;;  %v719_v56 = vld [vmem:[#allocation3 + $0x58] sm:$0xff] }
 0x256   :  { %1573 = vrcp.f32 %v2633_v55  ;;  %v1353_v52 = vsub.f32 %v1141_v54, %v1065_v12  ;;  %v1278_v11 = vmul.f32 %v2643_v53, %v2583_v48  ;;  %v1218_v23 = vmul.f32 %v2662_v27, %v2604_v24 }
 0x257   :  { %v753_v10 = vpop.xlane.xlu0 %752  ;;  %1575 = vrcp.f32 %v2646_v9  ;;  %v538_v39 = vmul.f32 1.442695, %v3113_v13  ;;  %v1261_v26 = vmul.f32 %v1260_v32, %v1089_v58  ;;  %v2701_v19 = vmul.f32 %v2586_v63, %v1159_v51  ;;  %v715_v13 = vld [vmem:[#allocation3 + $0x38] sm:$0xff] }
 0x258   :  { %v778_v21 = vadd.f32 %v753_v10, %v730_v61  ;;  %v745_v25 = vpop.xlane.xlu1 %744  ;;  %v1566_v30 = vpop.eup %1565  ;;  %v1369_v57 = vmul.f32 -1.0, %v1353_v52  ;;  %v1228_v36 = vand.u32 2147483648, %v2604_v24  ;;  %1577 = vpow2.f32 %v546_v6  ;;  %v2712_v61 = vld [vmem:[#allocation5 + $0x68] sm:$0xff] }
 0x259   :  { %v774_v34 = vadd.f32 %v745_v25, %v726_v16  ;;  %v2672_v41 = vpop.eup %1567  ;;  %v1051_v44 = vmul.f32 0.6931472, %v1566_v30  ;;  %v1205_v12 = vmul.f32 %v2601_v50, %v1204_v14  ;;  %1579 = vpow2.f32 %v554_v59 }
 0x25a   :  { %795 = vst.msk [vmem:[#allocation3 + $0x30] sm:$0xff] %vm371_vm3, %v778_v21  ;;  %v1570_v20 = vpop.eup %1569  ;;  %v1323_v37 = vmul.f32 %v2672_v41, %v2610_v62  ;;  %v1333_v51 = vand.u32 2147483648, %v2610_v62  ;;  %1581 = vpow2.f32 %v538_v39  ;;  %v1279_v16 = vsub.f32 1.0, %v1278_v11 }
 0x25b   :  { %1385 = vst.msk [vmem:[%s3017_s4 + $0x8] sm:$0xff] %vm371_vm3, %v1369_v57  ;;  %v1572_v47 = vpop.eup %1571  ;;  %v1073_v22 = vadd.f32 %v1051_v44, %v1009_v1  ;;  %v734_v10 = vmul.f32 %v1570_v20, %v718_v7  ;;  %v1219_v5 = vsub.f32 1.0, %v1218_v23  ;;  %1583 = vrcp.f32 %v2705_v31 }
 0x25c   :  { %791 = vst.msk [vmem:[#allocation3 + $0x10] sm:$0xff] %vm371_vm3, %v774_v34  ;;  %v2698_v40 = vpop.eup %1573  ;;  %v738_v52 = vmul.f32 %v1572_v47, %v722_v29  ;;  %1585 = vrcp.f32 %v2712_v61  ;;  %v1324_v18 = vsub.f32 1.0, %v1323_v37  ;;  %v1273_v57 = vand.u32 2147483648, %v2633_v55 }
 0x25d   :  { %v2707_v54 = vpop.eup %1575  ;;  %v1361_v46 = vsub.f32 %v1261_v26, %v1073_v22  ;;  %v2718_v14 = vmul.f32 %v2698_v40, %v2633_v55  ;;  %v1206_v34 = vadd.f32 %v2601_v50, %v1205_v12  ;;  %v3116_v17 = vsub.f32 %v3114_v15, %v3115_v28  ;;  %v711_v22 = vld [vmem:[#allocation3 + $0x18] sm:$0xff]  ;;  %v1028_v26 = vld [vmem:[#allocation3 + $0x60] sm:$0xff] }
 0x25e   :  { %v2723_v49 = vmul.f32 %v2707_v54, %v2646_v9  ;;  %v1578_v6 = vpop.eup %1577  ;;  %v2740_v1 = vmul.f32 %v2643_v53, %v1279_v16  ;;  %v1211_v32 = vand.u32 2147483647, %v2528_v4  ;;  %v1146_v42 = vadd.f32 %v2463_v0, %v2677_v35 }
 0x25f   :  { %v1377_v21 = vmul.f32 -1.0, %v1361_v46  ;;  %v761_v30 = vpop.xlane.xlu2 %760  ;;  %v562_v59 = vmul.f32 1.442695, %v3116_v17  ;;  %v1580_v20 = vpop.eup %1579  ;;  %v1220_v47 = vmul.f32 %v2662_v27, %v1219_v5  ;;  %v1303_v11 = vand.u32 2147483648, %v2646_v9  ;;  %v1082_v17 = vld [vmem:[#allocation4 + $0x10] sm:$0xff] }
 0x260   :  { %v769_v25 = vpop.xlane.xlu1 %768  ;;  %v782_v60 = vadd.f32 %v761_v30, %v734_v10  ;;  %v1582_v39 = vpop.eup %1581  ;;  %v1348_v23 = vand.u32 2147483648, %v2705_v31  ;;  %v1151_v35 = vand.u32 2147483647, %v2441_v45  ;;  %v2761_v7 = vmul.f32 %v2672_v41, %v1324_v18  ;;  %v817_v30 = vld [vmem:[#allocation4 + $0x60] sm:$0xff] }
 0x261   :  { %v1022_v3 = vld [vmem:[#allocation3 + $0x30] sm:$0xff]  ;;  %v786_v58 = vadd.f32 %v769_v25, %v738_v52  ;;  %1393 = vst.msk [vmem:[%s3017_s4 + $0x48] sm:$0xff] %vm371_vm3, %v1377_v21  ;;  %v2758_v29 = vpop.eup %1583  ;;  %v1264_v12 = vsub.f32 1.0, %v2718_v14  ;;  %v1294_v37 = vsub.f32 1.0, %v2723_v49  ;;  %v1214_v52 = vor.u32 1.1754944e-38, %v1213_v8 }
 0x262   :  { %1587 = vlog2.f32 %v1022_v3  ;;  %799 = vst.msk [vmem:[#allocation3 + $0x50] sm:$0xff] %vm371_vm3, %v782_v60  ;;  %v2775_v10 = vpop.eup %1585  ;;  %v1210_v16 = vsel %vm2769_vm4, %v2601_v50, %v1206_v34  ;;  %v735_v5 = vmul.f32 %v1580_v20, %v719_v56  ;;  %v731_v21 = vmul.f32 %v1578_v6, %v715_v13  ;;  %v1086_v14 = vld [vmem:[#allocation4 + $0x30] sm:$0xff] }
 0x263   :  { %v1018_v44 = vld [vmem:[#allocation3 + $0x10] sm:$0xff]  ;;  %803 = vst.msk [vmem:[#allocation3 + $0x70] sm:$0xff] %vm371_vm3, %v786_v58  ;;  %vm2780_vm5 = vcmp.eq.f32.partialorder %v1211_v32, 8.507059e+37  ;;  %v1150_v4 = vsel %vm2753_vm2, %v2463_v0, %v1146_v42  ;;  %v1154_v8 = vor.u32 1.1754944e-38, %v1153_v43  ;;  %v727_v60 = vmul.f32 %v1582_v39, %v711_v22 }
 0x264   :  { %1589 = vlog2.f32 %v1018_v44  ;;  %vm2790_vm7 = vcmp.eq.f32.partialorder %v1151_v35, 8.507059e+37  ;;  %v2797_v45 = vmul.f32 %v2775_v10, %v2712_v61  ;;  %v1338_v0 = vmul.f32 %v2758_v29, %v2705_v31  ;;  %v1006_v43 = vld [vmem:[#allocation2 + $0x30] sm:$0xff] }
 0x265   :  { %1591 = vpow2.f32 %v562_v59  ;;  %v1215_v28 = vsel %vm2780_vm5, %v1214_v52, %v1210_v16  ;;  %vm1223_vm9 = vweird.f32 %v2662_v27  ;;  %v1295_v42 = vmul.f32 %v2707_v54, %v1294_v37  ;;  %v1002_v56 = vld [vmem:[#allocation2 + $0x10] sm:$0xff]  ;;  %v723_v37 = vld [vmem:[#allocation3 + $0x78] sm:$0xff] }
 0x266   :  { %v1216_v44 = vmul.f32 %v1215_v28, %v1086_v14  ;;  %v1155_v13 = vsel %vm2790_vm7, %v1154_v8, %v1150_v4  ;;  %v2809_v39 = vadd.f32 %v2662_v27, %v1220_v47  ;;  %vm1163_vm10 = vweird.f32 %v2586_v63  ;;  %vm2822_vm11 = vmor %vm1222_vm15, %vm1223_vm9  ;;  %v816_v14 = vld [vmem:[#allocation4 + $0x58] sm:$0xff] }
 0x267   :  { %v755_v58 = vpop.xlane.xlu2 %754  ;;  %v2814_v22 = vmul.f32 %v2698_v40, %v1264_v12  ;;  %v1156_v46 = vmul.f32 %v1155_v13, %v1082_v17  ;;  %v1226_v12 = vand.u32 2147483647, %v2604_v24  ;;  %vm2833_vm12 = vmor %vm1162_vm1, %vm1163_vm10  ;;  %v1166_v8 = vand.u32 2147483647, %v2519_v33  ;;  %v1003_v33 = vld [vmem:[#allocation2 + $0x18] sm:$0xff] }
 0x268   :  { %v1588_v25 = vpop.eup %1587  ;;  %v763_v3 = vpop.xlane.xlu1 %762  ;;  %v779_v6 = vadd.f32 %v755_v58, %v731_v21  ;;  %v1339_v21 = vsub.f32 1.0, %v1338_v0  ;;  %1593 = vlog2.f32 %v1028_v26  ;;  %vm1298_vm13 = vweird.f32 %v2707_v54 }
 0x269   :  { %v1045_v18 = vmul.f32 0.6931472, %v1588_v25  ;;  %v783_v49 = vadd.f32 %v763_v3, %v735_v5  ;;  %v747_v34 = vpop.xlane.xlu0 %746  ;;  %v1309_v5 = vsub.f32 1.0, %v2797_v45  ;;  %v1161_v25 = vadd.f32 %v2586_v63, %v2701_v19  ;;  %vm2868_vm1 = vmor %vm1297_vm8, %vm1298_vm13 }
 0x26a   :  { %v1590_v15 = vpop.eup %1589  ;;  %v775_v59 = vadd.f32 %v747_v34, %v727_v60  ;;  %796 = vst.msk [vmem:[#allocation3 + $0x38] sm:$0xff] %vm371_vm3, %v779_v6  ;;  %v1225_v19 = vsel %vm2822_vm11, %v2662_v27, %v2809_v39  ;;  %v1296_v60 = vadd.f32 %v2707_v54, %v1295_v42  ;;  %vm1283_vm14 = vweird.f32 %v2643_v53  ;;  %v1030_v42 = vld [vmem:[#allocation3 + $0x70] sm:$0xff] }
 0x26b   :  { %v1070_v20 = vadd.f32 %v1045_v18, %v1006_v43  ;;  %v1037_v32 = vmul.f32 0.6931472, %v1590_v15  ;;  %800 = vst.msk [vmem:[#allocation3 + $0x58] sm:$0xff] %vm371_vm3, %v783_v49  ;;  %v1592_v35 = vpop.eup %1591  ;;  %v1165_v27 = vsel %vm2833_vm12, %v2586_v63, %v1161_v25  ;;  %v1169_v0 = vor.u32 1.1754944e-38, %v1168_v38  ;;  %vm2886_vm2 = vmor %vm1282_vm6, %vm1283_vm14 }
 0x26c   :  { %792 = vst.msk [vmem:[#allocation3 + $0x18] sm:$0xff] %vm371_vm3, %v775_v59  ;;  %v739_v49 = vmul.f32 %v1592_v35, %v723_v37  ;;  %v1301_v28 = vand.u32 2147483647, %v2646_v9  ;;  %vm1327_vm15 = vweird.f32 %v2610_v62  ;;  %vm2856_vm0 = vcmp.eq.f32.partialorder %v1166_v8, 8.507059e+37 }
 0x26d   :  { %v1358_v52 = vsub.f32 %v1216_v44, %v1070_v20  ;;  %v1066_v16 = vadd.f32 %v1037_v32, %v1002_v56  ;;  %v1281_v38 = vadd.f32 %v2643_v53, %v2740_v1  ;;  %v1286_v44 = vand.u32 2147483647, %v2583_v48 }
 0x26e   :  { %v1340_v20 = vmul.f32 %v2758_v29, %v1339_v21  ;;  %v1229_v32 = vor.u32 1.1754944e-38, %v1228_v36  ;;  %v1300_v13 = vsel %vm2868_vm1, %v2707_v54, %v1296_v60  ;;  %v1594_v39 = vpop.eup %1593  ;;  %v2891_v24 = vmul.f32 %v2775_v10, %v1309_v5  ;;  %v1026_v36 = vld [vmem:[#allocation3 + $0x50] sm:$0xff] }
 0x26f   :  { %v1374_v3 = vmul.f32 -1.0, %v1358_v52  ;;  %v1354_v58 = vsub.f32 %v1156_v46, %v1066_v16  ;;  %v860_v18 = vpop.xlane.xlu2 %859  ;;  %vm1227_vm4 = vcmp.eq.f32.partialorder %v1226_v12, 8.507059e+37  ;;  %v1304_v54 = vor.u32 1.1754944e-38, %v1303_v11  ;;  %v820_v52 = vld [vmem:[#allocation4 + $0x78] sm:$0xff]  ;;  %v819_v16 = vld [vmem:[#allocation4 + $0x70] sm:$0xff] }
 0x270   :  { %v862_v50 = vpop.xlane.xlu1 %861  ;;  %v880_v15 = vadd.f32 %v860_v18, %v816_v14  ;;  %vm1267_vm5 = vweird.f32 %v2633_v55  ;;  %v1230_v26 = vsel %vm1227_vm4, %v1229_v32, %v1225_v19  ;;  %v1170_v35 = vsel %vm2856_vm0, %v1169_v0, %v1165_v27  ;;  %v815_v5 = vld [vmem:[#allocation4 + $0x50] sm:$0xff]  ;;  %v1007_v27 = vld [vmem:[#allocation2 + $0x38] sm:$0xff] }
 0x271   :  { %1390 = vst.msk [vmem:[%s3017_s4 + $0x30] sm:$0xff] %vm371_vm3, %v1374_v3  ;;  %v1370_v6 = vmul.f32 -1.0, %v1354_v58  ;;  %v881_v34 = vadd.f32 %v862_v50, %v817_v30  ;;  %v771_v45 = vpop.xlane.xlu0 %770  ;;  %v1023_v63 = vld [vmem:[#allocation3 + $0x38] sm:$0xff]  ;;  %vm1302_vm6 = vcmp.eq.f32.partialorder %v1301_v28, 8.507059e+37  ;;  %v1289_v46 = vor.u32 1.1754944e-38, %v1288_v2  ;;  %v1012_v3 = vld [vmem:[#allocation2 + $0x60] sm:$0xff] }
 0x272   :  { %v1027_v43 = vld [vmem:[#allocation3 + $0x58] sm:$0xff]  ;;  %v787_v17 = vadd.f32 %v771_v45, %v739_v49  ;;  %896 = vst.msk [vmem:[#allocation4 + $0x58] sm:$0xff] %vm371_vm3, %v880_v15  ;;  %v1305_v37 = vsel %vm1302_vm6, %v1304_v54, %v1300_v13  ;;  %v1285_v9 = vsel %vm2886_vm2, %v2643_v53, %v1281_v38  ;;  %vm2905_vm7 = vcmp.eq.f32.partialorder %v1286_v44, 8.507059e+37  ;;  %v1029_v13 = vld [vmem:[#allocation3 + $0x68] sm:$0xff] }
 0x273   :  { %1386 = vst.msk [vmem:[%s3017_s4 + $0x10] sm:$0xff] %vm371_vm3, %v1370_v6  ;;  %1595 = vlog2.f32 %v1027_v43  ;;  %v1019_v56 = vld [vmem:[#allocation3 + $0x18] sm:$0xff]  ;;  %v1057_v21 = vmul.f32 0.6931472, %v1594_v39  ;;  %v2910_v48 = vadd.f32 %v2758_v29, %v1340_v20  ;;  %vm1343_vm8 = vweird.f32 %v2758_v29 }
 0x274   :  { %1597 = vlog2.f32 %v1023_v63  ;;  %897 = vst.msk [vmem:[#allocation4 + $0x60] sm:$0xff] %vm371_vm3, %v881_v34  ;;  %vm1342_vm9 = vweird.f32 %v2705_v31  ;;  %v1346_v25 = vand.u32 2147483647, %v2705_v31  ;;  %v2917_v30 = vadd.f32 %v2672_v41, %v2761_v7  ;;  %v1087_v58 = vld [vmem:[#allocation4 + $0x38] sm:$0xff] }
 0x275   :  { %1599 = vlog2.f32 %v1019_v56  ;;  %804 = vst.msk [vmem:[#allocation3 + $0x78] sm:$0xff] %vm371_vm3, %v787_v17  ;;  %v1290_v60 = vsel %vm2905_vm7, %v1289_v46, %v1285_v9  ;;  %v1331_v50 = vand.u32 2147483647, %v2610_v62  ;;  %v1083_v6 = vld [vmem:[#allocation4 + $0x18] sm:$0xff]  ;;  %vm1328_vm10 = vweird.f32 %v2672_v41  ;;  %v818_v46 = vld [vmem:[#allocation4 + $0x68] sm:$0xff]  ;;  %vm2963_vm14 = vmor %vm1342_vm9, %vm1343_vm8 }
 0x276   :  { %1601 = vlog2.f32 %v1030_v42  ;;  %v1011_v34 = vld [vmem:[#allocation2 + $0x58] sm:$0xff]  ;;  %v1266_v7 = vadd.f32 %v2698_v40, %v2814_v22  ;;  %vm1268_vm11 = vweird.f32 %v2698_v40  ;;  %v1076_v43 = vadd.f32 %v1057_v21, %v1012_v3  ;;  %vm2935_vm12 = vmor %vm1327_vm15, %vm1328_vm10  ;;  %v1010_v3 = vld [vmem:[#allocation2 + $0x50] sm:$0xff] }
 0x277   :  { %1603 = vlog2.f32 %v1026_v36  ;;  %v866_v47 = vpop.xlane.xlu2 %865  ;;  %v1231_v38 = vmul.f32 %v1230_v26, %v1087_v58  ;;  %v1334_v42 = vor.u32 1.1754944e-38, %v1333_v51  ;;  %v1171_v56 = vmul.f32 %v1170_v35, %v1083_v6  ;;  %vm2947_vm13 = vmor %vm1267_vm5, %vm1268_vm11 }
 0x278   :  { %v868_v2 = vpop.xlane.xlu1 %867  ;;  %v883_v14 = vadd.f32 %v866_v47, %v819_v16  ;;  %v1330_v51 = vsel %vm2935_vm12, %v2672_v41, %v2917_v30  ;;  %v1271_v62 = vand.u32 2147483647, %v2633_v55  ;;  %v1270_v9 = vsel %vm2947_vm13, %v2698_v40, %v1266_v7 }
 0x279   :  { %v1596_v12 = vpop.eup %1595  ;;  %v884_v53 = vadd.f32 %v868_v2, %v820_v52  ;;  %v858_v4 = vpop.xlane.xlu0 %857  ;;  %v1091_v59 = vld [vmem:[#allocation4 + $0x58] sm:$0xff]  ;;  %vm1332_vm15 = vcmp.eq.f32.partialorder %v1331_v50, 8.507059e+37  ;;  %v1274_v40 = vor.u32 1.1754944e-38, %v1273_v57  ;;  %v1345_v30 = vsel %vm2963_vm14, %v2758_v29, %v2910_v48 }
 0x27a   :  { %v1598_v8 = vpop.eup %1597  ;;  %v1055_v19 = vmul.f32 0.6931472, %v1596_v12  ;;  %v879_v18 = vadd.f32 %v858_v4, %v815_v5  ;;  %899 = vst.msk [vmem:[#allocation4 + $0x70] sm:$0xff] %vm371_vm3, %v883_v14  ;;  %v1291_v20 = vmul.f32 %v1290_v60, %v1091_v59  ;;  %v1335_v14 = vsel %vm1332_vm15, %v1334_v42, %v1330_v51 }
 0x27b   :  { %v1600_v49 = vpop.eup %1599  ;;  %v1047_v15 = vmul.f32 0.6931472, %v1598_v8  ;;  %v1092_v45 = vld [vmem:[#allocation4 + $0x60] sm:$0xff]  ;;  %900 = vst.msk [vmem:[#allocation4 + $0x78] sm:$0xff] %vm371_vm3, %v884_v53  ;;  %v1014_v53 = vld [vmem:[#allocation2 + $0x70] sm:$0xff]  ;;  %vm1272_vm0 = vcmp.eq.f32.partialorder %v1271_v62, 8.507059e+37  ;;  %vm1313_vm2 = vweird.f32 %v2775_v10  ;;  %vm1312_vm4 = vweird.f32 %v2712_v61 }
 0x27c   :  { %v1039_v0 = vmul.f32 0.6931472, %v1600_v49  ;;  %v1306_v28 = vmul.f32 %v1305_v37, %v1092_v45  ;;  %v1075_v17 = vadd.f32 %v1055_v19, %v1011_v34  ;;  %v1602_v63 = vpop.eup %1601  ;;  %v1031_v32 = vld [vmem:[#allocation3 + $0x78] sm:$0xff]  ;;  %895 = vst.msk [vmem:[#allocation4 + $0x50] sm:$0xff] %vm371_vm3, %v879_v18  ;;  %v1349_v55 = vor.u32 1.1754944e-38, %v1348_v23  ;;  %vm1314_vm5 = vmor %vm1312_vm4, %vm1313_vm2 }
 0x27d   :  { %v1071_v44 = vadd.f32 %v1047_v15, %v1007_v27  ;;  %v1604_v22 = vpop.eup %1603  ;;  %1605 = vlog2.f32 %v1031_v32  ;;  %v1061_v52 = vmul.f32 0.6931472, %v1602_v63  ;;  %v1275_v60 = vsel %vm1272_vm0, %v1274_v40, %v1270_v9  ;;  %v1015_v49 = vld [vmem:[#allocation2 + $0x78] sm:$0xff] }
 0x27e   :  { %v1067_v1 = vadd.f32 %v1039_v0, %v1003_v33  ;;  %v1364_v39 = vsub.f32 %v1306_v28, %v1076_v43  ;;  %v1363_v26 = vsub.f32 %v1291_v20, %v1075_v17  ;;  %1607 = vlog2.f32 %v1029_v13 }
 0x27f   :  { %v1359_v54 = vsub.f32 %v1231_v38, %v1071_v44  ;;  %v1053_v41 = vmul.f32 0.6931472, %v1604_v22  ;;  %v1078_v58 = vadd.f32 %v1061_v52, %v1014_v53  ;;  %vm1347_vm1 = vcmp.eq.f32.partialorder %v1346_v25, 8.507059e+37 }
 0x280   :  { %v1355_v16 = vsub.f32 %v1171_v56, %v1067_v1  ;;  %v1380_v37 = vmul.f32 -1.0, %v1364_v39  ;;  %v1379_v5 = vmul.f32 -1.0, %v1363_v26  ;;  %v1350_v6 = vsel %vm1347_vm1, %v1349_v55, %v1345_v30 }
 0x281   :  { %v1375_v11 = vmul.f32 -1.0, %v1359_v54  ;;  %v864_v21 = vpop.xlane.xlu0 %863  ;;  %v1094_v4 = vld [vmem:[#allocation4 + $0x70] sm:$0xff]  ;;  %v1074_v48 = vadd.f32 %v1053_v41, %v1010_v3  ;;  %v1311_v23 = vadd.f32 %v2775_v10, %v2891_v24  ;;  %v1318_v45 = vand.u32 2147483648, %v2712_v61 }
 0x282   :  { %v1371_v2 = vmul.f32 -1.0, %v1355_v16  ;;  %1396 = vst.msk [vmem:[%s3017_s4 + $0x60] sm:$0xff] %vm371_vm3, %v1380_v37  ;;  %v882_v12 = vadd.f32 %v864_v21, %v818_v46  ;;  %v1095_v57 = vld [vmem:[#allocation4 + $0x78] sm:$0xff]  ;;  %v1336_v19 = vmul.f32 %v1335_v14, %v1094_v4  ;;  %v1316_v25 = vand.u32 2147483647, %v2712_v61  ;;  %v1013_v61 = vld [vmem:[#allocation2 + $0x68] sm:$0xff] }
 0x283   :  { %1391 = vst.msk [vmem:[%s3017_s4 + $0x38] sm:$0xff] %vm371_vm3, %v1375_v11  ;;  %v1606_v8 = vpop.eup %1605  ;;  %v1090_v50 = vld [vmem:[#allocation4 + $0x50] sm:$0xff]  ;;  %v1351_v27 = vmul.f32 %v1350_v6, %v1095_v57  ;;  %v1315_v24 = vsel %vm1314_vm5, %v2775_v10, %v1311_v23  ;;  %v1319_v63 = vor.u32 1.1754944e-38, %v1318_v45 }
 0x284   :  { %1387 = vst.msk [vmem:[%s3017_s4 + $0x18] sm:$0xff] %vm371_vm3, %v1371_v2  ;;  %v1063_v29 = vmul.f32 0.6931472, %v1606_v8  ;;  %v1276_v18 = vmul.f32 %v1275_v60, %v1090_v50  ;;  %v1366_v34 = vsub.f32 %v1336_v19, %v1078_v58  ;;  %v1608_v15 = vpop.eup %1607  ;;  %vm1317_vm6 = vcmp.eq.f32.partialorder %v1316_v25, 8.507059e+37 }
 0x285   :  { %1395 = vst.msk [vmem:[%s3017_s4 + $0x58] sm:$0xff] %vm371_vm3, %v1379_v5  ;;  %v1059_v17 = vmul.f32 0.6931472, %v1608_v15  ;;  %v1320_v33 = vsel %vm1317_vm6, %v1319_v63, %v1315_v24 }
 0x286   :  { %898 = vst.msk [vmem:[#allocation4 + $0x68] sm:$0xff] %vm371_vm3, %v882_v12  ;;  %v1079_v7 = vadd.f32 %v1063_v29, %v1015_v49  ;;  %v1362_v0 = vsub.f32 %v1276_v18, %v1074_v48  ;;  %v1382_v31 = vmul.f32 -1.0, %v1366_v34 }
 0x287   :  { %v1077_v44 = vadd.f32 %v1059_v17, %v1013_v61 }
 0x288   :  { %v1367_v43 = vsub.f32 %v1351_v27, %v1079_v7  ;;  %v1378_v28 = vmul.f32 -1.0, %v1362_v0  ;;  %1398 = vst.msk [vmem:[%s3017_s4 + $0x70] sm:$0xff] %vm371_vm3, %v1382_v31 }
 0x28a   :  { %v1383_v59 = vmul.f32 -1.0, %v1367_v43  ;;  %1394 = vst.msk [vmem:[%s3017_s4 + $0x50] sm:$0xff] %vm371_vm3, %v1378_v28 }
 0x28c   :  { %1399 = vst.msk [vmem:[%s3017_s4 + $0x78] sm:$0xff] %vm371_vm3, %v1383_v59 }
 0x28d   :  { %v1093_v38 = vld [vmem:[#allocation4 + $0x68] sm:$0xff] }
 0x28e   :  { %v1321_v20 = vmul.f32 %v1320_v33, %v1093_v38 }
 0x290   :  { %v1365_v32 = vsub.f32 %v1321_v20, %v1077_v44 }
 0x292   :  { %v1381_v10 = vmul.f32 -1.0, %v1365_v32 }
 0x294   :  { %1397 = vst.msk [vmem:[%s3017_s4 + $0x68] sm:$0xff] %vm371_vm3, %v1381_v10 }
 0x295   :  { %1404 = vsyncpa [#allocation7], 1 }

</bundles_post_ra>
